<compile_context>
chip_gen: v5e
topology: v5e:2x2
jax: 0.10.0
libtpu: 0.0.40
codegen_flags: <defaults>
</compile_context>

<pallas_src>
import jax
import jax.numpy as jnp
import numpy as np
from jax.experimental import pallas as pl
from jax.experimental.pallas import tpu as pltpu


def _round_up(x, m):
    return ((x + m - 1) // m) * m


def _make_kernel(KH, KH2, n_ln_real, eps=1e-5):
    inv_n = 1.0 / float(n_ln_real)

    def shift_up(m, i):
        # m shifted up by i rows; the rows that wrap around only ever feed the
        # per-image "overhang" output rows, which are discarded on the host.
        if i == 0:
            return m
        return jnp.concatenate([m[i:, :], m[:i, :]], axis=0)

    def kernel(x_ref, w1_ref, b1_ref, g_ref, beta_ref, w2_ref, b2_ref, o_ref):
        # x_ref : (B*H, Kp0)      bf16, lane-padded NHWC rows of B images
        # w1_ref: (KH*Kp0, Kp1)   bf16 lowered (Toeplitz) conv1 weights
        # b1/g/beta: (1, Kp1)     f32, zero beyond the real W1*C1 lanes
        # w2_ref: (KH2*Kp1, Kp2)  bf16 lowered conv2 weights
        # b2_ref: (1, Kp2)        f32
        # o_ref : (B*H, Kp2)      f32
        x = x_ref[...]

        # ---- conv1: one MXU matmul for the whole row block ----------------
        p1 = jnp.concatenate([shift_up(x, i) for i in range(KH)], axis=1)
        a = jnp.dot(p1, w1_ref[...], preferred_element_type=jnp.float32)
        a = a + b1_ref[...]                                   # (B*H, Kp1) f32

        # ---- LayerNorm over (C1, W1) of the NHCW-permuted tensor ----------
        # == per-row over the real (unpadded) W1*C1 lanes.  Padded lanes of
        # `a` are exactly 0, so a plain lane-sum with inv_n = 1/(W1*C1) is the
        # exact mean; the variance is two-pass with a lane mask.
        mu = jnp.sum(a, axis=1, keepdims=True) * inv_n
        lane = jax.lax.broadcasted_iota(jnp.int32, a.shape, 1)
        d = jnp.where(lane < n_ln_real, a - mu, 0.0)
        var = jnp.sum(d * d, axis=1, keepdims=True) * inv_n
        t = d * jax.lax.rsqrt(var + eps) * g_ref[...] + beta_ref[...]
        # padded lanes of t are exactly 0 (gamma/beta padded with zeros)

        # ---- conv2: same single-matmul structure ---------------------------
        tb = t.astype(jnp.bfloat16)
        p2 = jnp.concatenate([shift_up(tb, i) for i in range(KH2)], axis=1)
        out = jnp.dot(p2, w2_ref[...], preferred_element_type=jnp.float32)
        o_ref[...] = (out + b2_ref[...]).astype(o_ref.dtype)   # full-slab store

    return kernel


def _lowered_weights(f_oihw, w_in, w_out, k_in_pad, k_out_pad):
    """Lower an OIHW filter to a (KH*k_in_pad, k_out_pad) matrix such that
    patches @ Wb == VALID conv, with patch columns (i*k_in_pad + w'*Cin + ci)
    holding x[ci, h+i, w'] and output columns (w*Cout + c).  Rows/cols beyond
    the real W_in*Cin / W_out*Cout extents are zero (lane padding)."""
    c_out, c_in, kh, kw = f_oihw.shape
    ft = jnp.transpose(f_oihw, (2, 1, 3, 0)).astype(jnp.float32)   # (kh,cin,kw,cout)
    j = jnp.arange(kw)[:, None, None]
    wp = jnp.arange(w_in)[None, :, None]
    w = jnp.arange(w_out)[None, None, :]
    onehot = (wp == w + j).astype(jnp.float32)                     # (kw,w_in,w_out)
    wb = jnp.einsum('abkd,kpq->apbqd', ft, onehot)                 # (kh,w_in,cin,w_out,cout)
    wb = wb.reshape(kh, w_in * c_in, w_out * c_out)
    wb = jnp.pad(wb, ((0, 0),
                      (0, k_in_pad - w_in * c_in),
                      (0, k_out_pad - w_out * c_out)))
    return wb.reshape(kh * k_in_pad, k_out_pad)


def layernorm_nhcw_with_conv_after(x_nchw, f1_oihw, b1, f2_oihw, b2,
                                   ln_weight, ln_bias, *, target_rows=256):
    """Forward of the PyTorch module (stride=1, padding=0, dilation=1,
    groups=1).  Returns NCHW output.  target_rows ~256 for v6e/v7x, ~128 is
    enough for v5e's 128-row MXU."""
    N, Cin, H, W = x_nchw.shape
    C1, _, KH, KW = f1_oihw.shape
    C2, _, KH2, KW2 = f2_oihw.shape
    H1, W1 = H - KH + 1, W - KW + 1
    H2, W2 = H1 - KH2 + 1, W1 - KW2 + 1
    assert ln_weight.shape == (C1, W1) and ln_bias.shape == (C1, W1)
    f32, bf16 = jnp.float32, jnp.bfloat16

    # Lane padding to 128 (unmasked stores, aligned concats, aligned MXU K/N).
    Kp0 = _round_up(W * Cin, 128)
    Kp1 = _round_up(W1 * C1, 128)
    Kp2 = _round_up(W2 * C2, 128)

    # ---- batch blocking: fill the MXU M dim, keep >=2 grid steps ----------
    B = max(1, min(N, target_rows // max(H, 1)))
    if N >= 2:
        B = min(B, (N + 1) // 2)        # >=2 grid steps (v7x: two TensorCores)
    while (B * H) % 8 and B < N:        # sublane-tile alignment of row block
        B += 1
    Np = _round_up(N, B)
    if (B * H) % 8:                     # last resort: one full-array block
        B = Np
    G = Np // B
    rows = B * H

    # ---- host-side layout plumbing (free relative to the kernel) ----------
    x2d = jnp.transpose(x_nchw, (0, 2, 3, 1)).reshape(N, H, W * Cin)
    x2d = jnp.pad(x2d, ((0, Np - N), (0, 0), (0, Kp0 - W * Cin)))
    x2d = x2d.reshape(Np * H, Kp0).astype(bf16)

    w1 = _lowered_weights(f1_oihw, W, W1, Kp0, Kp1).astype(bf16)
    w2 = _lowered_weights(f2_oihw, W1, W2, Kp1, Kp2).astype(bf16)

    def pad_row(v, kp):
        v = v.astype(f32).reshape(1, -1)
        return jnp.pad(v, ((0, 0), (0, kp - v.shape[1])))

    b1f = pad_row(jnp.broadcast_to(b1.astype(f32)[None, :], (W1, C1)), Kp1)
    b2f = pad_row(jnp.broadcast_to(b2.astype(f32)[None, :], (W2, C2)), Kp2)
    gf = pad_row(jnp.transpose(ln_weight), Kp1)       # gamma[w*C1 + c] = w[c, w]
    betaf = pad_row(jnp.transpose(ln_bias), Kp1)

    kernel = _make_kernel(KH, KH2, W1 * C1)

    # VMEM budget from the actual block sizes (weights counted once: they are
    # single-buffered below).  For large W/C on v7x (64 MiB VMEM) tile the
    # output-column dim or stream the Toeplitz weights from HBM instead.
    budget = (2 * rows * Kp0 * 2 +            # x block, bf16, double-buffered
              2 * rows * Kp2 * 4 +            # out block, f32, double-buffered
              KH * Kp0 * Kp1 * 2 +            # w1, bf16
              KH2 * Kp1 * Kp2 * 2 +           # w2, bf16
              4 * (3 * Kp1 + Kp2) +           # biases / gamma / beta, f32
              4 * rows * (KH * Kp0 + KH2 * Kp1 + 2 * Kp1))  # in-kernel temps
    vmem_limit = max(32 * 1024 * 1024, int(1.3 * budget) + (4 << 20))

    def run(single_buffer_invariants):
        def const_spec(shape):
            kw = {}
            if single_buffer_invariants:
                kw["pipeline_mode"] = pl.Buffered(1)   # invariant -> 1 buffer
            return pl.BlockSpec(shape, lambda n: (0, 0), **kw)

        out2d = pl.pallas_call(
            kernel,
            out_shape=jax.ShapeDtypeStruct((Np * H, Kp2), f32),
            grid=(G,),
            in_specs=[
                pl.BlockSpec((rows, Kp0), lambda n: (n, 0)),
                const_spec((KH * Kp0, Kp1)),
                const_spec((1, Kp1)),
                const_spec((1, Kp1)),
                const_spec((1, Kp1)),
                const_spec((KH2 * Kp1, Kp2)),
                const_spec((1, Kp2)),
            ],
            out_specs=pl.BlockSpec((rows, Kp2), lambda n: (n, 0)),
            compiler_params=pltpu.CompilerParams(
                dimension_semantics=("parallel",),
                vmem_limit_bytes=vmem_limit),
        )(x2d, w1, b1f, gf, betaf, w2, b2f)
        return jax.block_until_ready(out2d)

    try:
        out2d = run(single_buffer_invariants=True)
    except Exception:
        # pl.Buffered(1) single-buffering not supported on this JAX version:
        # fall back to default double-buffering of the invariant operands.
        out2d = run(single_buffer_invariants=False)

    # (Np*H, Kp2) -> keep the valid (n, h < H2) rows and real W2*C2 lanes.
    out = out2d.reshape(Np, H, Kp2)[:N, :H2, :W2 * C2]
    out = out.reshape(N, H2, W2, C2)
    return jnp.transpose(out, (0, 3, 1, 2))            # NCHW


def _reference(x, f1, b1, f2, b2, g, beta):
    dn = ("NCHW", "OIHW", "NCHW")
    c1 = jax.lax.conv_general_dilated(x, f1, (1, 1), "VALID",
                                      dimension_numbers=dn)
    c1 = c1 + b1[None, :, None, None]
    p = jnp.transpose(c1, (0, 2, 1, 3))                # (N, H, C, W)
    mean = jnp.mean(p, axis=(2, 3), keepdims=True)
    var = jnp.mean((p - mean) ** 2, axis=(2, 3), keepdims=True)
    t = (p - mean) / jnp.sqrt(var + 1e-5) * g[None, None] + beta[None, None]
    t = jnp.transpose(t, (0, 2, 1, 3))                 # back to (N, C, H, W)
    c2 = jax.lax.conv_general_dilated(t, f2, (1, 1), "VALID",
                                      dimension_numbers=dn)
    return c2 + b2[None, :, None, None]


if __name__ == "__main__":
    # Small shapes consistent with the module (stride=1, pad=0).  N=8 so the
    # batched row-blocking is exercised: B=4 images/step, 2 grid steps.
    N, Cin, H, W = 8, 4, 16, 16
    C1, KH, KW = 8, 3, 3
    C2, KH2, KW2 = 4, 3, 3
    H1, W1 = H - KH + 1, W - KW + 1                    # 14, 14
    normalized_shape = (C1, W1)                        # LN over (C, W) of NHCW

    key = jax.random.PRNGKey(0)
    ks = jax.random.split(key, 7)
    inputs = jax.random.normal(ks[0], (N, Cin, H, W), jnp.float32)
    filters = jax.random.normal(ks[1], (C1, Cin, KH, KW), jnp.float32) * 0.2
    filters2 = jax.random.normal(ks[2], (C2, C1, KH2, KW2), jnp.float32) * 0.2
    biasConv = jax.random.normal(ks[3], (C1,), jnp.float32) * 0.1
    biasConv2 = jax.random.normal(ks[4], (C2,), jnp.float32) * 0.1
    weight = 1.0 + 0.1 * jax.random.normal(ks[5], normalized_shape, jnp.float32)
    bias = 0.1 * jax.random.normal(ks[6], normalized_shape, jnp.float32)

    out = layernorm_nhcw_with_conv_after(inputs, filters, biasConv,
                                         filters2, biasConv2, weight, bias)
    out = jax.block_until_ready(out)

    ref = jax.block_until_ready(_reference(inputs, filters, biasConv,
                                           filters2, biasConv2, weight, bias))

    assert out.shape == ref.shape
    # Tolerance accounts for bf16 MXU inputs (f32 accumulate + f32 LayerNorm);
    # a structural/layout bug would produce O(1) errors and still fail this.
    np.testing.assert_allclose(np.asarray(out), np.asarray(ref),
                               rtol=5e-2, atol=5e-2)
    print("KERNEL_OK")
</pallas_src>

<mosaic_0001>
module attributes {stable_mosaic.version = 11 : i64} {
  func.func @kernel(%arg0: i32, %arg1: memref<64x128xbf16, #tpu.memory_space<vmem>>, %arg2: memref<384x128xbf16, #tpu.memory_space<vmem>>, %arg3: memref<1x128xf32, #tpu.memory_space<vmem>>, %arg4: memref<1x128xf32, #tpu.memory_space<vmem>>, %arg5: memref<1x128xf32, #tpu.memory_space<vmem>>, %arg6: memref<384x128xbf16, #tpu.memory_space<vmem>>, %arg7: memref<1x128xf32, #tpu.memory_space<vmem>>, %arg8: memref<64x128xf32, #tpu.memory_space<vmem>>) attributes {dimension_semantics = [#tpu.dimension_semantics<parallel>], iteration_bounds = array<i64: 2>, scalar_prefetch = 0 : i64, scratch_operands = 0 : i64, tpu.core_type = #tpu.core_type<tc>, window_params = [{transform_indices = @transform_0, window_bounds = array<i64: 64, 128>}, {pipeline_mode = #tpu.pipeline_mode<synchronous>, transform_indices = @transform_1, window_bounds = array<i64: 384, 128>}, {pipeline_mode = #tpu.pipeline_mode<synchronous>, transform_indices = @transform_2, window_bounds = array<i64: 1, 128>}, {pipeline_mode = #tpu.pipeline_mode<synchronous>, transform_indices = @transform_3, window_bounds = array<i64: 1, 128>}, {pipeline_mode = #tpu.pipeline_mode<synchronous>, transform_indices = @transform_4, window_bounds = array<i64: 1, 128>}, {pipeline_mode = #tpu.pipeline_mode<synchronous>, transform_indices = @transform_5, window_bounds = array<i64: 384, 128>}, {pipeline_mode = #tpu.pipeline_mode<synchronous>, transform_indices = @transform_6, window_bounds = array<i64: 1, 128>}, {transform_indices = @transform_7, window_bounds = array<i64: 64, 128>}]} {
    %c0 = arith.constant 0 : index
    %c0_0 = arith.constant 0 : index
    %0 = vector.load %arg1[%c0, %c0_0] : memref<64x128xbf16, #tpu.memory_space<vmem>>, vector<64x128xbf16>
    %1 = vector.extract_strided_slice %0 {offsets = [1, 0], sizes = [63, 128], strides = [1, 1]} : vector<64x128xbf16> to vector<63x128xbf16>
    %2 = vector.extract_strided_slice %0 {offsets = [0, 0], sizes = [1, 128], strides = [1, 1]} : vector<64x128xbf16> to vector<1x128xbf16>
    %3 = tpu.concatenate %1, %2 in 0 : vector<63x128xbf16>, vector<1x128xbf16> -> vector<64x128xbf16>
    %4 = vector.extract_strided_slice %0 {offsets = [2, 0], sizes = [62, 128], strides = [1, 1]} : vector<64x128xbf16> to vector<62x128xbf16>
    %5 = vector.extract_strided_slice %0 {offsets = [0, 0], sizes = [2, 128], strides = [1, 1]} : vector<64x128xbf16> to vector<2x128xbf16>
    %6 = tpu.concatenate %4, %5 in 0 : vector<62x128xbf16>, vector<2x128xbf16> -> vector<64x128xbf16>
    %7 = tpu.concatenate %0, %3, %6 in 1 : vector<64x128xbf16>, vector<64x128xbf16>, vector<64x128xbf16> -> vector<64x384xbf16>
    %c0_1 = arith.constant 0 : index
    %c0_2 = arith.constant 0 : index
    %8 = vector.load %arg2[%c0_1, %c0_2] : memref<384x128xbf16, #tpu.memory_space<vmem>>, vector<384x128xbf16>
    %cst = arith.constant dense<0.000000e+00> : vector<64x128xf32>
    %9 = tpu.matmul %7, %8, %cst {dimension_numbers = #tpu.dot_dimension_numbers<[1], [0], [0], [1], [0, 0, 1, 1], [], []>} : vector<64x384xbf16>, vector<384x128xbf16>, vector<64x128xf32> -> vector<64x128xf32>
    %c0_3 = arith.constant 0 : index
    %c0_4 = arith.constant 0 : index
    %10 = vector.load %arg3[%c0_3, %c0_4] : memref<1x128xf32, #tpu.memory_space<vmem>>, vector<1x128xf32>
    %11 = vector.broadcast %10 : vector<1x128xf32> to vector<64x128xf32>
    %12 = arith.addf %9, %11 : vector<64x128xf32>
    %cst_5 = arith.constant dense<0.000000e+00> : vector<64xf32>
    %13 = vector.multi_reduction <add>, %12, %cst_5 [1] : vector<64x128xf32> to vector<64xf32>
    %14 = vector.shape_cast %13 : vector<64xf32> to vector<64x1xf32>
    %cst_6 = arith.constant 0.00892857183 : f32
    %15 = vector.broadcast %cst_6 : f32 to vector<64x1xf32>
    %16 = arith.mulf %14, %15 : vector<64x1xf32>
    %17 = tpu.iota {dimensions = array<i32: 1>} : vector<64x128xi32>
    %c112_i32 = arith.constant 112 : i32
    %18 = vector.broadcast %c112_i32 : i32 to vector<64x128xi32>
    %19 = arith.cmpi slt, %17, %18 : vector<64x128xi32>
    %20 = vector.broadcast %16 : vector<64x1xf32> to vector<64x128xf32>
    %21 = arith.subf %12, %20 : vector<64x128xf32>
    %cst_7 = arith.constant 0.000000e+00 : f32
    %22 = vector.broadcast %cst_7 : f32 to vector<64x128xf32>
    %23 = arith.select %19, %21, %22 : vector<64x128xi1>, vector<64x128xf32>
    %24 = arith.mulf %23, %23 : vector<64x128xf32>
    %cst_8 = arith.constant dense<0.000000e+00> : vector<64xf32>
    %25 = vector.multi_reduction <add>, %24, %cst_8 [1] : vector<64x128xf32> to vector<64xf32>
    %26 = vector.shape_cast %25 : vector<64xf32> to vector<64x1xf32>
    %cst_9 = arith.constant 0.00892857183 : f32
    %27 = vector.broadcast %cst_9 : f32 to vector<64x1xf32>
    %28 = arith.mulf %26, %27 : vector<64x1xf32>
    %cst_10 = arith.constant 9.99999974E-6 : f32
    %29 = vector.broadcast %cst_10 : f32 to vector<64x1xf32>
    %30 = arith.addf %28, %29 : vector<64x1xf32>
    %31 = math.rsqrt %30 : vector<64x1xf32>
    %32 = vector.broadcast %31 : vector<64x1xf32> to vector<64x128xf32>
    %33 = arith.mulf %23, %32 : vector<64x128xf32>
    %c0_11 = arith.constant 0 : index
    %c0_12 = arith.constant 0 : index
    %34 = vector.load %arg4[%c0_11, %c0_12] : memref<1x128xf32, #tpu.memory_space<vmem>>, vector<1x128xf32>
    %35 = vector.broadcast %34 : vector<1x128xf32> to vector<64x128xf32>
    %36 = arith.mulf %33, %35 : vector<64x128xf32>
    %c0_13 = arith.constant 0 : index
    %c0_14 = arith.constant 0 : index
    %37 = vector.load %arg5[%c0_13, %c0_14] : memref<1x128xf32, #tpu.memory_space<vmem>>, vector<1x128xf32>
    %38 = vector.broadcast %37 : vector<1x128xf32> to vector<64x128xf32>
    %39 = arith.addf %36, %38 : vector<64x128xf32>
    %40 = arith.truncf %39 : vector<64x128xf32> to vector<64x128xbf16>
    %41 = vector.extract_strided_slice %40 {offsets = [1, 0], sizes = [63, 128], strides = [1, 1]} : vector<64x128xbf16> to vector<63x128xbf16>
    %42 = vector.extract_strided_slice %40 {offsets = [0, 0], sizes = [1, 128], strides = [1, 1]} : vector<64x128xbf16> to vector<1x128xbf16>
    %43 = tpu.concatenate %41, %42 in 0 : vector<63x128xbf16>, vector<1x128xbf16> -> vector<64x128xbf16>
    %44 = vector.extract_strided_slice %40 {offsets = [2, 0], sizes = [62, 128], strides = [1, 1]} : vector<64x128xbf16> to vector<62x128xbf16>
    %45 = vector.extract_strided_slice %40 {offsets = [0, 0], sizes = [2, 128], strides = [1, 1]} : vector<64x128xbf16> to vector<2x128xbf16>
    %46 = tpu.concatenate %44, %45 in 0 : vector<62x128xbf16>, vector<2x128xbf16> -> vector<64x128xbf16>
    %47 = tpu.concatenate %40, %43, %46 in 1 : vector<64x128xbf16>, vector<64x128xbf16>, vector<64x128xbf16> -> vector<64x384xbf16>
    %c0_15 = arith.constant 0 : index
    %c0_16 = arith.constant 0 : index
    %48 = vector.load %arg6[%c0_15, %c0_16] : memref<384x128xbf16, #tpu.memory_space<vmem>>, vector<384x128xbf16>
    %cst_17 = arith.constant dense<0.000000e+00> : vector<64x128xf32>
    %49 = tpu.matmul %47, %48, %cst_17 {dimension_numbers = #tpu.dot_dimension_numbers<[1], [0], [0], [1], [0, 0, 1, 1], [], []>} : vector<64x384xbf16>, vector<384x128xbf16>, vector<64x128xf32> -> vector<64x128xf32>
    %c0_18 = arith.constant 0 : index
    %c0_19 = arith.constant 0 : index
    %50 = vector.load %arg7[%c0_18, %c0_19] : memref<1x128xf32, #tpu.memory_space<vmem>>, vector<1x128xf32>
    %51 = vector.broadcast %50 : vector<1x128xf32> to vector<64x128xf32>
    %52 = arith.addf %49, %51 : vector<64x128xf32>
    %c0_20 = arith.constant 0 : index
    %c0_21 = arith.constant 0 : index
    %53 = vector.load %arg8[%c0_20, %c0_21] : memref<64x128xf32, #tpu.memory_space<vmem>>, vector<64x128xf32>
    tpu.vector_store %arg8[%c0_20, %c0_21], %52 {strides = array<i32>} : memref<64x128xf32, #tpu.memory_space<vmem>>, vector<64x128xf32>,
    return
  }
  func.func @transform_0(%arg0: i32) -> (i32, i32) {
    %c0_i32 = arith.constant 0 : i32
    %c0_i32_0 = arith.constant 0 : i32
    return %arg0, %c0_i32 : i32, i32
  }
  func.func @transform_1(%arg0: i32) -> (i32, i32) {
    %c0_i32 = arith.constant 0 : i32
    %c0_i32_0 = arith.constant 0 : i32
    %c0_i32_1 = arith.constant 0 : i32
    return %c0_i32, %c0_i32_0 : i32, i32
  }
  func.func @transform_2(%arg0: i32) -> (i32, i32) {
    %c0_i32 = arith.constant 0 : i32
    %c0_i32_0 = arith.constant 0 : i32
    %c0_i32_1 = arith.constant 0 : i32
    return %c0_i32, %c0_i32_0 : i32, i32
  }
  func.func @transform_3(%arg0: i32) -> (i32, i32) {
    %c0_i32 = arith.constant 0 : i32
    %c0_i32_0 = arith.constant 0 : i32
    %c0_i32_1 = arith.constant 0 : i32
    return %c0_i32, %c0_i32_0 : i32, i32
  }
  func.func @transform_4(%arg0: i32) -> (i32, i32) {
    %c0_i32 = arith.constant 0 : i32
    %c0_i32_0 = arith.constant 0 : i32
    %c0_i32_1 = arith.constant 0 : i32
    return %c0_i32, %c0_i32_0 : i32, i32
  }
  func.func @transform_5(%arg0: i32) -> (i32, i32) {
    %c0_i32 = arith.constant 0 : i32
    %c0_i32_0 = arith.constant 0 : i32
    %c0_i32_1 = arith.constant 0 : i32
    return %c0_i32, %c0_i32_0 : i32, i32
  }
  func.func @transform_6(%arg0: i32) -> (i32, i32) {
    %c0_i32 = arith.constant 0 : i32
    %c0_i32_0 = arith.constant 0 : i32
    %c0_i32_1 = arith.constant 0 : i32
    return %c0_i32, %c0_i32_0 : i32, i32
  }
  func.func @transform_7(%arg0: i32) -> (i32, i32) {
    %c0_i32 = arith.constant 0 : i32
    %c0_i32_0 = arith.constant 0 : i32
    return %arg0, %c0_i32 : i32, i32
  }
}

module attributes {stable_mosaic.version = 11 : i64} {
  func.func @kernel(%arg0: i32, %arg1: memref<64x128xbf16, #tpu.memory_space<vmem>>, %arg2: memref<384x128xbf16, #tpu.memory_space<vmem>>, %arg3: memref<1x128xf32, #tpu.memory_space<vmem>>, %arg4: memref<1x128xf32, #tpu.memory_space<vmem>>, %arg5: memref<1x128xf32, #tpu.memory_space<vmem>>, %arg6: memref<384x128xbf16, #tpu.memory_space<vmem>>, %arg7: memref<1x128xf32, #tpu.memory_space<vmem>>, %arg8: memref<64x128xf32, #tpu.memory_space<vmem>>) attributes {dimension_semantics = [#tpu.dimension_semantics<parallel>], iteration_bounds = array<i64: 2>, scalar_prefetch = 0 : i64, scratch_operands = 0 : i64, tpu.core_type = #tpu.core_type<tc>, window_params = [{transform_indices = @transform_0, window_bounds = array<i64: 64, 128>}, {pipeline_mode = #tpu.pipeline_mode<synchronous>, transform_indices = @transform_1, window_bounds = array<i64: 384, 128>}, {pipeline_mode = #tpu.pipeline_mode<synchronous>, transform_indices = @transform_2, window_bounds = array<i64: 1, 128>}, {pipeline_mode = #tpu.pipeline_mode<synchronous>, transform_indices = @transform_3, window_bounds = array<i64: 1, 128>}, {pipeline_mode = #tpu.pipeline_mode<synchronous>, transform_indices = @transform_4, window_bounds = array<i64: 1, 128>}, {pipeline_mode = #tpu.pipeline_mode<synchronous>, transform_indices = @transform_5, window_bounds = array<i64: 384, 128>}, {pipeline_mode = #tpu.pipeline_mode<synchronous>, transform_indices = @transform_6, window_bounds = array<i64: 1, 128>}, {transform_indices = @transform_7, window_bounds = array<i64: 64, 128>}]} {
    %c0 = arith.constant 0 : index
    %c0_0 = arith.constant 0 : index
    %0 = vector.load %arg1[%c0, %c0_0] : memref<64x128xbf16, #tpu.memory_space<vmem>>, vector<64x128xbf16>
    %1 = vector.extract_strided_slice %0 {offsets = [1, 0], sizes = [63, 128], strides = [1, 1]} : vector<64x128xbf16> to vector<63x128xbf16>
    %2 = vector.extract_strided_slice %0 {offsets = [0, 0], sizes = [1, 128], strides = [1, 1]} : vector<64x128xbf16> to vector<1x128xbf16>
    %3 = tpu.concatenate %1, %2 in 0 : vector<63x128xbf16>, vector<1x128xbf16> -> vector<64x128xbf16>
    %4 = vector.extract_strided_slice %0 {offsets = [2, 0], sizes = [62, 128], strides = [1, 1]} : vector<64x128xbf16> to vector<62x128xbf16>
    %5 = vector.extract_strided_slice %0 {offsets = [0, 0], sizes = [2, 128], strides = [1, 1]} : vector<64x128xbf16> to vector<2x128xbf16>
    %6 = tpu.concatenate %4, %5 in 0 : vector<62x128xbf16>, vector<2x128xbf16> -> vector<64x128xbf16>
    %7 = tpu.concatenate %0, %3, %6 in 1 : vector<64x128xbf16>, vector<64x128xbf16>, vector<64x128xbf16> -> vector<64x384xbf16>
    %c0_1 = arith.constant 0 : index
    %c0_2 = arith.constant 0 : index
    %8 = vector.load %arg2[%c0_1, %c0_2] : memref<384x128xbf16, #tpu.memory_space<vmem>>, vector<384x128xbf16>
    %cst = arith.constant dense<0.000000e+00> : vector<64x128xf32>
    %9 = tpu.matmul %7, %8, %cst {dimension_numbers = #tpu.dot_dimension_numbers<[1], [0], [0], [1], [0, 0, 1, 1], [], []>} : vector<64x384xbf16>, vector<384x128xbf16>, vector<64x128xf32> -> vector<64x128xf32>
    %c0_3 = arith.constant 0 : index
    %c0_4 = arith.constant 0 : index
    %10 = vector.load %arg3[%c0_3, %c0_4] : memref<1x128xf32, #tpu.memory_space<vmem>>, vector<1x128xf32>
    %11 = vector.broadcast %10 : vector<1x128xf32> to vector<64x128xf32>
    %12 = arith.addf %9, %11 : vector<64x128xf32>
    %cst_5 = arith.constant dense<0.000000e+00> : vector<64xf32>
    %13 = vector.multi_reduction <add>, %12, %cst_5 [1] : vector<64x128xf32> to vector<64xf32>
    %14 = vector.shape_cast %13 : vector<64xf32> to vector<64x1xf32>
    %cst_6 = arith.constant 0.00892857183 : f32
    %15 = vector.broadcast %cst_6 : f32 to vector<64x1xf32>
    %16 = arith.mulf %14, %15 : vector<64x1xf32>
    %17 = tpu.iota {dimensions = array<i32: 1>} : vector<64x128xi32>
    %c112_i32 = arith.constant 112 : i32
    %18 = vector.broadcast %c112_i32 : i32 to vector<64x128xi32>
    %19 = arith.cmpi slt, %17, %18 : vector<64x128xi32>
    %20 = vector.broadcast %16 : vector<64x1xf32> to vector<64x128xf32>
    %21 = arith.subf %12, %20 : vector<64x128xf32>
    %cst_7 = arith.constant 0.000000e+00 : f32
    %22 = vector.broadcast %cst_7 : f32 to vector<64x128xf32>
    %23 = arith.select %19, %21, %22 : vector<64x128xi1>, vector<64x128xf32>
    %24 = arith.mulf %23, %23 : vector<64x128xf32>
    %cst_8 = arith.constant dense<0.000000e+00> : vector<64xf32>
    %25 = vector.multi_reduction <add>, %24, %cst_8 [1] : vector<64x128xf32> to vector<64xf32>
    %26 = vector.shape_cast %25 : vector<64xf32> to vector<64x1xf32>
    %cst_9 = arith.constant 0.00892857183 : f32
    %27 = vector.broadcast %cst_9 : f32 to vector<64x1xf32>
    %28 = arith.mulf %26, %27 : vector<64x1xf32>
    %cst_10 = arith.constant 9.99999974E-6 : f32
    %29 = vector.broadcast %cst_10 : f32 to vector<64x1xf32>
    %30 = arith.addf %28, %29 : vector<64x1xf32>
    %31 = math.rsqrt %30 : vector<64x1xf32>
    %32 = vector.broadcast %31 : vector<64x1xf32> to vector<64x128xf32>
    %33 = arith.mulf %23, %32 : vector<64x128xf32>
    %c0_11 = arith.constant 0 : index
    %c0_12 = arith.constant 0 : index
    %34 = vector.load %arg4[%c0_11, %c0_12] : memref<1x128xf32, #tpu.memory_space<vmem>>, vector<1x128xf32>
    %35 = vector.broadcast %34 : vector<1x128xf32> to vector<64x128xf32>
    %36 = arith.mulf %33, %35 : vector<64x128xf32>
    %c0_13 = arith.constant 0 : index
    %c0_14 = arith.constant 0 : index
    %37 = vector.load %arg5[%c0_13, %c0_14] : memref<1x128xf32, #tpu.memory_space<vmem>>, vector<1x128xf32>
    %38 = vector.broadcast %37 : vector<1x128xf32> to vector<64x128xf32>
    %39 = arith.addf %36, %38 : vector<64x128xf32>
    %40 = arith.truncf %39 : vector<64x128xf32> to vector<64x128xbf16>
    %41 = vector.extract_strided_slice %40 {offsets = [1, 0], sizes = [63, 128], strides = [1, 1]} : vector<64x128xbf16> to vector<63x128xbf16>
    %42 = vector.extract_strided_slice %40 {offsets = [0, 0], sizes = [1, 128], strides = [1, 1]} : vector<64x128xbf16> to vector<1x128xbf16>
    %43 = tpu.concatenate %41, %42 in 0 : vector<63x128xbf16>, vector<1x128xbf16> -> vector<64x128xbf16>
    %44 = vector.extract_strided_slice %40 {offsets = [2, 0], sizes = [62, 128], strides = [1, 1]} : vector<64x128xbf16> to vector<62x128xbf16>
    %45 = vector.extract_strided_slice %40 {offsets = [0, 0], sizes = [2, 128], strides = [1, 1]} : vector<64x128xbf16> to vector<2x128xbf16>
    %46 = tpu.concatenate %44, %45 in 0 : vector<62x128xbf16>, vector<2x128xbf16> -> vector<64x128xbf16>
    %47 = tpu.concatenate %40, %43, %46 in 1 : vector<64x128xbf16>, vector<64x128xbf16>, vector<64x128xbf16> -> vector<64x384xbf16>
    %c0_15 = arith.constant 0 : index
    %c0_16 = arith.constant 0 : index
    %48 = vector.load %arg6[%c0_15, %c0_16] : memref<384x128xbf16, #tpu.memory_space<vmem>>, vector<384x128xbf16>
    %cst_17 = arith.constant dense<0.000000e+00> : vector<64x128xf32>
    %49 = tpu.matmul %47, %48, %cst_17 {dimension_numbers = #tpu.dot_dimension_numbers<[1], [0], [0], [1], [0, 0, 1, 1], [], []>} : vector<64x384xbf16>, vector<384x128xbf16>, vector<64x128xf32> -> vector<64x128xf32>
    %c0_18 = arith.constant 0 : index
    %c0_19 = arith.constant 0 : index
    %50 = vector.load %arg7[%c0_18, %c0_19] : memref<1x128xf32, #tpu.memory_space<vmem>>, vector<1x128xf32>
    %51 = vector.broadcast %50 : vector<1x128xf32> to vector<64x128xf32>
    %52 = arith.addf %49, %51 : vector<64x128xf32>
    %c0_20 = arith.constant 0 : index
    %c0_21 = arith.constant 0 : index
    %53 = vector.load %arg8[%c0_20, %c0_21] : memref<64x128xf32, #tpu.memory_space<vmem>>, vector<64x128xf32>
    tpu.vector_store %arg8[%c0_20, %c0_21], %52 {strides = array<i32>} : memref<64x128xf32, #tpu.memory_space<vmem>>, vector<64x128xf32>,
    return
  }
  func.func @transform_0(%arg0: i32) -> (i32, i32) {
    %c0_i32 = arith.constant 0 : i32
    %c0_i32_0 = arith.constant 0 : i32
    return %arg0, %c0_i32 : i32, i32
  }
  func.func @transform_1(%arg0: i32) -> (i32, i32) {
    %c0_i32 = arith.constant 0 : i32
    %c0_i32_0 = arith.constant 0 : i32
    %c0_i32_1 = arith.constant 0 : i32
    return %c0_i32, %c0_i32_0 : i32, i32
  }
  func.func @transform_2(%arg0: i32) -> (i32, i32) {
    %c0_i32 = arith.constant 0 : i32
    %c0_i32_0 = arith.constant 0 : i32
    %c0_i32_1 = arith.constant 0 : i32
    return %c0_i32, %c0_i32_0 : i32, i32
  }
  func.func @transform_3(%arg0: i32) -> (i32, i32) {
    %c0_i32 = arith.constant 0 : i32
    %c0_i32_0 = arith.constant 0 : i32
    %c0_i32_1 = arith.constant 0 : i32
    return %c0_i32, %c0_i32_0 : i32, i32
  }
  func.func @transform_4(%arg0: i32) -> (i32, i32) {
    %c0_i32 = arith.constant 0 : i32
    %c0_i32_0 = arith.constant 0 : i32
    %c0_i32_1 = arith.constant 0 : i32
    return %c0_i32, %c0_i32_0 : i32, i32
  }
  func.func @transform_5(%arg0: i32) -> (i32, i32) {
    %c0_i32 = arith.constant 0 : i32
    %c0_i32_0 = arith.constant 0 : i32
    %c0_i32_1 = arith.constant 0 : i32
    return %c0_i32, %c0_i32_0 : i32, i32
  }
  func.func @transform_6(%arg0: i32) -> (i32, i32) {
    %c0_i32 = arith.constant 0 : i32
    %c0_i32_0 = arith.constant 0 : i32
    %c0_i32_1 = arith.constant 0 : i32
    return %c0_i32, %c0_i32_0 : i32, i32
  }
  func.func @transform_7(%arg0: i32) -> (i32, i32) {
    %c0_i32 = arith.constant 0 : i32
    %c0_i32_0 = arith.constant 0 : i32
    return %arg0, %c0_i32 : i32, i32
  }
}

</mosaic_0001>

<bundles_post_ra>
// kernel: tpu_custom_call.1
= control target key start
LH: loop header
LB: loop body
LE: loop exit
PB: predicated region body
PF: predicated region fallthrough
CT: control target
= control target key end

     0   :  { %s2289_s0 = inlined_call_operand.hbm [shape: bf16[128,128], index: 0, kind: input, shape index: {}]   ;;  %s2290_s1 = inlined_call_operand.hbm [shape: bf16[384,128], index: 1, kind: input, shape index: {}]   ;;  %s2291_s2 = inlined_call_operand.vmem [shape: f32[1,128], index: 2, kind: input, shape index: {}]   ;;  %s2292_s3 = inlined_call_operand.vmem [shape: f32[1,128], index: 3, kind: input, shape index: {}]   ;;  %s2293_s4 = inlined_call_operand.vmem [shape: f32[1,128], index: 4, kind: input, shape index: {}]   ;;  %s2294_s5 = inlined_call_operand.hbm [shape: bf16[384,128], index: 5, kind: input, shape index: {}]   ;;  %s2295_s6 = inlined_call_operand.vmem [shape: f32[1,128], index: 6, kind: input, shape index: {}]   ;;  %s2296_s7 = inlined_call_operand.hbm [shape: f32[128,128], index: 7, kind: output, shape index: {}]  }
   0x1   :  { %2299 = sst [smem:[#allocation12_spill]] %s2290_s1 }
   0x2   :  { %12 = vsyncpa [#allocation3], 0 }
   0x3   :  { %14 = vsyncpa [#allocation3 + $0x1], 0 }
   0x4   :  { %15 = vsyncpa [#allocation6], 0 }
   0x5   :  { %16 = vsyncpa [#allocation4], 0 }
   0x6   :  { %18 = vsyncpa [#allocation4 + $0x1], 0  ;;  %s1988_s24 = smov 0   ;;  %s1990_s25 = smov 0  }
   0x7   :  { %s1992_s26 = smov 0   ;;  %s1994_s27 = smov 0  }
   0x8 LB: > { %s2009_s28 = sadd.s32 4294967295, %s1940_s27   ;;  %s1394_s29 = sadd.s32 4294967294, %s1940_s27   ;;  %s1940_s27 = sphi %s1994_s27, %s2314_s27   ;;  %s1936_s26 = sphi %s1992_s26, %s2313_s26   ;;  %s1932_s25 = sphi %s1990_s25, %s2312_s25   ;;  %s1928_s24 = sphi %s1988_s24, %s2311_s24  }
   0x9   : > { %p44_p0 = scmp.ne.s32.totalorder %s1932_s25, %s1928_s24  ;;  %p45_p1 = scmp.eq.s32.totalorder %s2009_s28, 0 }
   0xa   : > { %p194_p2 = scmp.eq.s32.totalorder %s2009_s28, 1  ;;  %p200_p3 = scmp.eq.s32.totalorder %s1394_s29, 1 }
   0xb   : > { %p2018_p4 = por %p45_p1, %p44_p0  ;;  %p1395_p5 = scmp.ge.s32.totalorder %s1940_s27, 1 }
   0xc   : > { %p2023_p6 = por %p200_p3, %p44_p0  ;;  %p207_p7 = scmp.lt.s32.totalorder %s1940_s27, 3 }
   0xd   : > { %s2302_s1 = sld [smem:[#allocation12_spill]]  ;;  %s1942_s13 = smov [#allocation5]  }
   0xe   : > { %p2031_p8 = pnand %p1395_p5, %p207_p7  ;;  %s220_s14 = sshll.u32 %s1942_s13, 4  ;;  %s221_s14 = int_to_ptr.vmem [resolvable:$true] %s220_s14 }
   0xf   : > { %s241_s17 = sshll.u32 %s2294_s5, 4  ;;  %s2297_s18 = smov 64   ;;  %s242_s17 = int_to_ptr.hbm [resolvable:$true] %s241_s17 }
  0x10   : > { %p1701_p9 = pneg %p2031_p8  ;;  %s2298_s19 = smov 4  }
  0x11   : > { %s1945_s20 = smov [#allocation7]   ;;  %s2050_s22 = sadd.s32 1, %s1940_s27  }
  0x12   : > { %p1702_p10 = pnand %p1701_p9, %p45_p1  ;;  %s243_s21 = sshll.u32 %s1945_s20, 4  ;;  %s244_s21 = int_to_ptr.vmem [resolvable:$true] %s243_s21 }
  0x13   : > { %s218_s11 = sshll.u32 %s2302_s1, 4  ;;  %s31_s23 = sadd.s32 1, %s1936_s26  ;;  %s219_s11 = int_to_ptr.hbm [resolvable:$true] %s218_s11 }
  0x14   : > { %1704 = dma.hbm_to_vmem [thread:$0]  (!%p1702_p10), %s219_s11, 3072, %s221_s14, [#allocation6], %s2297_s18, %s2297_s18, %s2298_s19  }
  0x15   : > { %1707 = dma.hbm_to_vmem [thread:$0]  (!%p1702_p10), %s242_s17, 3072, %s244_s21, [#allocation6], %s2297_s18, %s2297_s18, %s2298_s19  }
  0x16   : > { %s28_s29 = ssub.s32 %s1940_s27, %s2050_s22  ;;  %p38_p12 = scmp.ne.s32.totalorder %s1936_s26, %s1932_s25 }
  0x17   : > { %p29_p13 = scmp.eq.s32.totalorder %s28_s29, 0  ;;  %p39_p0 = scmp.eq.s32.totalorder %s1940_s27, 0 }
  0x18   : > { %p2060_p3 = por %p194_p2, %p38_p12  ;;  %p1718_p5 = scmp.lt.s32.totalorder %s1940_s27, 2 }
  0x19   : > { %s2066_s10 = scalar_select %p29_p13, %s1936_s26, %s31_s23  }
  0x1a   : > { %p40_p7 = por %p39_p0, %p38_p12  ;;  %s260_s11 = sand.u32 1, %s1936_s26  }
  0x1b   : > { %s1399_s13 = sshll.u32 %s260_s11, 5  ;;  %s1616_s14 = sshll.u32 %s1940_s27, 5 }
  0x1c   : > { %s269_s17 = scalar_lea.hbm %s2289_s0, %s1616_s14  ;;  %s264_s20 = scalar_lea.vmem [#allocation2], %s1399_s13 }
  0x1d   : > { %s272_s21 = sshll.u32 %s264_s20, 4  ;;  %s270_s29 = sshll.u32 %s269_s17, 4  ;;  %s273_s21 = int_to_ptr.vmem [resolvable:$true] %s272_s21  ;;  %s271_s29 = int_to_ptr.hbm [resolvable:$true] %s270_s29 }
  0x1e   : > { %p2073_p2 = pnand %p1718_p5, %p40_p7  ;;  %s261_s23 = scalar_lea.sflag [#allocation3], %s260_s11 }
  0x1f   : > { %s1840_s19 = sshra.s32 %s271_s29, 4  ;;  %s1847_s15 = scalar_lea.hbm %s2289_s0, 64  ;;  %s1841_s19 = int_to_ptr.hbm [resolvable:$true] %s1840_s19 }
  0x20   : > { %s1842_s1 = scalar_lea.hbm %s1841_s19, 32  ;;  %p1844_p10 = pneg %p2073_p2 }
  0x21   : > { %p1843_p9 = scmp.ne.s32.totalorder %s1841_s19, %s1842_s1  ;;  %p1848_p0 = scmp.lt.s32.totalorder %s1841_s19, %s2289_s0 }
  0x22   : > { %p1849_p5 = scmp.lt.s32.totalorder %s1847_s15, %s1842_s1 }
  0x23   : > { %p1845_p12 = pnand %p1844_p10, %p1843_p9 }
  0x24   : > { %p1850_p7 = por %p1849_p5, %p1848_p0 }
  0x25   : > { %p1846_p13 = pneg %p1845_p12 }
  0x27   : > { %p1851_p11 = pnand %p1850_p7, %p1846_p13 }
  0x29   : > { %1854 = shalt.err (!%p1851_p11)
}
  0x2a   : > { %s2306_s11 = smov 4   ;;  %s2307_s20 = smov 64  }
  0x2b   : > { %1711 = dma.hbm_to_vmem [thread:$0]  (!%p2073_p2), %s271_s29, 512, %s273_s21, %s261_s23, %s2307_s20, %s2307_s20, %s2306_s11  }
  0x2c   : > { %284 = sbr.rel (%p2031_p8) target bundleno = 742 (0x2e6), region = 48  ;;  %s2093_s14 = sand.u32 (!%p2031_p8), 1, %s1932_s25  }
  0x2d   : > { %s1403_s19 = sshll.u32 (!%p2031_p8), %s2093_s14, 5  ;;  %s287_s1 = scalar_lea.sflag (!%p2031_p8), [#allocation3], %s2093_s14 }
  0x2e   : > { %s2097_s13 = scalar_lea.vmem (!%p2031_p8), [#allocation2], %s1403_s19 }
  0x31   : > { %1915 = dma.done.wait (%p2018_p4), %s287_s1, 512  }
  0x32   : > { %1917 = vsyncadd (%p2018_p4), %s287_s1, 4294966784 }
  0x33   : > { %1919 = dma.done.wait (%p45_p1), [#allocation6], 6144  }
  0x34   : > { %1921 = vsyncadd (%p45_p1), [#allocation6], 4294961152  ;;  %v1627_v0 = vld [vmem:[#allocation5 + $0x38] sm:$0xff]  ;;  %v1626_v2 = vld [vmem:[#allocation5 + $0x30] sm:$0xff]  ;;  %vm362_vm0 = vsmask.f32 7424 }
  0x35   : > { %v1635_v1 = vld [vmem:[#allocation5 + $0x78] sm:$0xff]  ;;  %1673 = vmatpush.bf16.msra.mxu2 %v1627_v0  ;;  %v1634_v3 = vld [vmem:[#allocation5 + $0x70] sm:$0xff]  ;;  %624 = vmatpush.bf16.msra.mxu0 %v1627_v0  ;;  %v1625_v4 = vld [vmem:[#allocation5 + $0x28] sm:$0xff]  ;;  %vm404_vm1 = vcmask 1047552   ;;  %vm407_vm3 = vcmask 1046528   ;;  %s1406_s17 = sshll.u32 %s2093_s14, 6 }
  0x36   : > { %1681 = vmatpush.bf16.msra.mxu3 %v1635_v1  ;;  %653 = vmatpush.bf16.msra.mxu1 %v1635_v1  ;;  %v1633_v5 = vld [vmem:[#allocation5 + $0x68] sm:$0xff]  ;;  %v1624_v6 = vld [vmem:[#allocation5 + $0x20] sm:$0xff]  ;;  %v1623_v8 = vld [vmem:[#allocation5 + $0x18] sm:$0xff]  ;;  %s2245_s11 = scalar_lea.vmem [#allocation8], %s1406_s17  ;;  %s1668_s20 = sshll.u32 %s2009_s28, 6 }
  0x37   : > { %v1632_v7 = vld [vmem:[#allocation5 + $0x60] sm:$0xff]  ;;  %v1631_v9 = vld [vmem:[#allocation5 + $0x58] sm:$0xff]  ;;  %v2108_v10 = vld [vmem:[%s2097_s13 + $0x10] sm:$0xff]  ;;  %s1299_s30 = sshll.u32 %s2245_s11, 4  ;;  %s1287_s18 = scalar_lea.sflag [#allocation4], %s2093_s14  ;;  %s1300_s30 = int_to_ptr.vmem [resolvable:$true] %s1299_s30 }
  0x38   : > { %v1622_v11 = vld [vmem:[#allocation5 + $0x10] sm:$0xff]  ;;  %v2111_v13 = vld [vmem:[%s2097_s13 + $0x18] sm:$0xff]  ;;  %v379_v14 = vshll.u32 %v2108_v10, 16  ;;  %v1621_v15 = vld [vmem:[#allocation5 + $0x8] sm:$0xff]  ;;  %v383_v19 = vshrl.u32 %v2108_v10, 16  ;;  %v411_v59 = vrot.slane %v2108_v10, 1 }
  0x39   : > { %1674 = vmatpush.bf16.msra.mxu2 %v1626_v2  ;;  %625 = vmatpush.bf16.msra.mxu0 %v1626_v2  ;;  %v1630_v12 = vld [vmem:[#allocation5 + $0x50] sm:$0xff]  ;;  %v2115_v16 = vld [vmem:[%s2097_s13] sm:$0xff]   ;;  %v1629_v17 = vld [vmem:[#allocation5 + $0x48] sm:$0xff]  ;;  %v387_v20 = vshll.u32 %v2111_v13, 16  ;;  %v391_v39 = vshrl.u32 %v2111_v13, 16  ;;  %v413_v56 = vrot.slane %v2111_v13, 1 }
  0x3a   : > { %1682 = vmatpush.bf16.msra.mxu3 %v1634_v3  ;;  %654 = vmatpush.bf16.msra.mxu1 %v1634_v3  ;;  %v381_v18 = vrot.slane %v379_v14, 1  ;;  %v2120_v21 = vld [vmem:[%s2097_s13 + $0x8] sm:$0xff]  ;;  %v366_v22 = vshll.u32 %v2115_v16, 16  ;;  %v364_v23 = vshrl.u32 %v2115_v16, 16  ;;  %v1620_v26 = vld [vmem:[#allocation5] sm:$0xff]  ;;  %v1643_v30 = vld [vmem:[#allocation5 + $0xb8] sm:$0xff]  ;;  %v1671_v34 = vunpack.c.l.b16 %v2115_v16  ;;  %s1298_s13 = scalar_lea.hbm %s2296_s7, %s1668_s20 }
  0x3b   : > { %v371_v25 = vshll.u32 %v2120_v21, 16  ;;  %v1628_v27 = vld [vmem:[#allocation5 + $0x40] sm:$0xff]  ;;  %v389_v29 = vrot.slane %v387_v20, 1  ;;  %v1642_v35 = vld [vmem:[#allocation5 + $0xb0] sm:$0xff]  ;;  %v1641_v38 = vld [vmem:[#allocation5 + $0xa8] sm:$0xff]  ;;  %v375_v42 = vshrl.u32 %v2120_v21, 16  ;;  %v414_v61 = vsel %vm407_vm3, %v411_v59, %v413_v56 }
  0x3c   : > { %v368_v24 = vrot.slane %v366_v22, 1  ;;  %v385_v28 = vor.u32 %v383_v19, %v381_v18  ;;  %v398_v37 = vpack.c.b16 %v1671_v34, %v1671_v34  ;;  %v1640_v41 = vld [vmem:[#allocation5 + $0xa0] sm:$0xff]  ;;  %v1639_v45 = vld [vmem:[#allocation5 + $0x98] sm:$0xff]  ;;  %vm2133_vm2 = vmand %vm404_vm1, %vm362_vm0  ;;  %v408_v53 = vrot.slane %v2115_v16, 1  ;;  %s1301_s12 = sshll.u32 %s1298_s13, 4  ;;  %s1890_s15 = scalar_lea.hbm %s2296_s7, 128  ;;  %s1302_s12 = int_to_ptr.hbm [resolvable:$true] %s1301_s12 }
  0x3d   : > { %1675 = vmatpush.bf16.msra.mxu2 %v1625_v4  ;;  %626 = vmatpush.bf16.msra.mxu0 %v1625_v4  ;;  %v373_v32 = vrot.slane %v371_v25, 1  ;;  %v393_v43 = vor.u32 %v391_v39, %v389_v29  ;;  %v1638_v49 = vld [vmem:[#allocation5 + $0x90] sm:$0xff]  ;;  %v1637_v51 = vld [vmem:[#allocation5 + $0x88] sm:$0xff]  ;;  %v1636_v52 = vld [vmem:[#allocation5 + $0x80] sm:$0xff]  ;;  %v409_v54 = vrot.slane %v2120_v21, 1  ;;  %s1884_s28 = sshra.s32 %s1302_s12, 4  ;;  %s1885_s28 = int_to_ptr.hbm [resolvable:$true] %s1884_s28 }
  0x3e   : > { %1683 = vmatpush.bf16.msra.mxu3 %v1633_v5  ;;  %655 = vmatpush.bf16.msra.mxu1 %v1633_v5  ;;  %v369_v31 = vor.u32 %v368_v24, %v364_v23  ;;  %v390_v33 = vsel %vm362_vm0, %v385_v28, %v389_v29  ;;  %v400_v40 = vshll.u32 %v398_v37, 16  ;;  %v418_v57 = vrot.slane %v398_v37, 1  ;;  %v1760_v3 = vld [vmem:[%s2291_s2] ss:$0 sm:$0xff]  ;;  %s1886_s21 = scalar_lea.hbm %s1885_s28, 64  ;;  %p1891_p11 = scmp.lt.s32.totalorder %s1885_s28, %s2296_s7 }
  0x3f   : > { %v377_v47 = vor.u32 %v375_v42, %v373_v32  ;;  %v410_v55 = vsel %vm407_vm3, %v408_v53, %v409_v54  ;;  %v412_v60 = vsel %vm407_vm3, %v409_v54, %v411_v59  ;;  %p1887_p1 = scmp.ne.s32.totalorder %s1885_s28, %s1886_s21  ;;  %p1892_p2 = scmp.lt.s32.totalorder %s1890_s15, %s1886_s21 }
  0x40   : > { %v374_v36 = vsel %vm362_vm0, %v369_v31, %v373_v32  ;;  %v402_v44 = vrot.slane %v400_v40, 1  ;;  %v422_v58 = vsel %vm407_vm3, %v413_v56, %v418_v57 }
  0x41   : > { %1676 = vmatpush.bf16.msra.mxu2 %v1624_v6  ;;  %627 = vmatpush.bf16.msra.mxu0 %v1624_v6  ;;  %v382_v50 = vsel %vm362_vm0, %v377_v47, %v381_v18  ;;  %p1888_p4 = pnand %p1887_p1, %p2060_p3  ;;  %p1893_p9 = por %p1892_p2, %p1891_p11 }
  0x42   : > { %1684 = vmatpush.bf16.msra.mxu3 %v1632_v7  ;;  %656 = vmatpush.bf16.msra.mxu1 %v1632_v7  ;;  %v406_v48 = vsel %vm2133_vm2, %v393_v43, %v402_v44 }
  0x43   : > { %p1889_p8 = pneg %p1888_p4 }
  0x45   : > { %1677 = vmatpush.bf16.msra.mxu2 %v1623_v8  ;;  %628 = vmatpush.bf16.msra.mxu0 %v1623_v8  ;;  %p1894_p10 = pnand %p1893_p9, %p1889_p8 }
  0x46   : > { %1685 = vmatpush.bf16.msra.mxu3 %v1631_v9  ;;  %657 = vmatpush.bf16.msra.mxu1 %v1631_v9 }
  0x49   : > { %1678 = vmatpush.bf16.msra.mxu2 %v1622_v11  ;;  %629 = vmatpush.bf16.msra.mxu0 %v1622_v11 }
  0x4a   : > { %1686 = vmatpush.bf16.msra.mxu3 %v1630_v12  ;;  %658 = vmatpush.bf16.msra.mxu1 %v1630_v12 }
  0x4d   : > { %1679 = vmatpush.bf16.msra.mxu2 %v1621_v15  ;;  %630 = vmatpush.bf16.msra.mxu0 %v1621_v15 }
  0x4e   : > { %1687 = vmatpush.bf16.msra.mxu3 %v1629_v17  ;;  %659 = vmatpush.bf16.msra.mxu1 %v1629_v17 }
  0x51   : > { %1680 = vmatpush.bf16.msra.mxu2 %v1620_v26  ;;  %631 = vmatpush.bf16.msra.mxu0 %v1620_v26 }
  0x52   : > { %1688 = vmatpush.bf16.msra.mxu3 %v1628_v27  ;;  %660 = vmatpush.bf16.msra.mxu1 %v1628_v27 }
  0x54   : > { %642 = vmatmul.bf16.vlgmr.msra.gmra.mxu2 %v2108_v10  ;;  %632 = vmatmul.bf16.vlgmr.msra.gmra.mxu0 %v2115_v16 }
  0x55   : > { %682 = vmatpush.bf16.msrb.mxu2 %v1643_v30  ;;  %671 = vmatmul.bf16.vlgmr.msra.gmra.mxu3 %v390_v33 }
  0x56   : > { %661 = vmatmul.bf16.vlgmr.msra.gmra.mxu1 %v374_v36 }
  0x59   : > { %683 = vmatpush.bf16.msrb.mxu2 %v1642_v35 }
  0x5d   : > { %684 = vmatpush.bf16.msrb.mxu2 %v1641_v38 }
  0x61   : > { %685 = vmatpush.bf16.msrb.mxu2 %v1640_v41 }
  0x64   : > { %647 = vmatmul.bf16.gmra.mxu2 %v2111_v13  ;;  %637 = vmatmul.bf16.gmra.mxu0 %v2120_v21 }
  0x65   : > { %686 = vmatpush.bf16.msrb.mxu2 %v1639_v45  ;;  %676 = vmatmul.bf16.gmra.mxu3 %v406_v48  ;;  %v735_v48 = vlaneseq }
  0x66   : > { %666 = vmatmul.bf16.gmra.mxu1 %v382_v50 }
  0x69   : > { %687 = vmatpush.bf16.msrb.mxu2 %v1638_v49  ;;  %v736_v49 = vand.u32 127, %v735_v48 }
  0x6b   : > { %vm737_vm4 = vcmp.lt.s32.totalorder %v736_v49, 112  ;;  %v1656_v49 = vld [vmem:[#allocation7 + $0x60] sm:$0xff] }
  0x6d   : > { %688 = vmatpush.bf16.msrb.mxu2 %v1637_v51 }
  0x71   : > { %689 = vmatpush.bf16.msrb.mxu2 %v1636_v52 }
  0x74   : > { %690 = vmatmul.bf16.vlgmr.msrb.gmra.mxu2 %v410_v55 }
  0x84   : > { %695 = vmatmul.bf16.gmra.mxu2 %v412_v60 }
  0x94   : > { %700 = vmatmul.bf16.gmra.mxu2 %v414_v61 }
  0xa4   : > { %705 = vmatmul.bf16.gmra.mxu2 %v422_v58 }
  0xd1   : > { %v633_v1 = vpop.f32.mrf.mxu0 }
  0xd2   : > { %v634_v5 = vadd.f32 %v1760_v3, %v633_v1 }
  0xd3   : > { %v662_v2 = vpop.f32.mrf.mxu1 }
  0xd4   : > { %v663_v7 = vadd.f32 %v662_v2, %v634_v5 }
  0xd7   : > { %v643_v62 = vpop.f32.mrf.mxu2 }
  0xd8   : > { %v672_v24 = vpop.f32.mrf.mxu3  ;;  %v644_v28 = vadd.f32 %v1760_v3, %v643_v62 }
  0xd9   : > { %v635_v6 = vpop.f32.mrf.mxu0 }
  0xda   : > { %v636_v11 = vadd.f32 %v1760_v3, %v635_v6  ;;  %v673_v29 = vadd.f32 %v672_v24, %v644_v28  ;;  %v1649_v28 = vld [vmem:[#allocation7 + $0x28] sm:$0xff] }
  0xdb   : > { %v664_v8 = vpop.f32.mrf.mxu1 }
  0xdc   : > { %v665_v13 = vadd.f32 %v664_v8, %v636_v11 }
  0xdf   : > { %v645_v63 = vpop.f32.mrf.mxu2 }
  0xe0   : > { %v674_v30 = vpop.f32.mrf.mxu3  ;;  %v646_v33 = vadd.f32 %v1760_v3, %v645_v63 }
  0xe1   : > { %v638_v12 = vpop.f32.mrf.mxu0 }
  0xe2   : > { %v639_v15 = vadd.f32 %v1760_v3, %v638_v12  ;;  %v675_v34 = vadd.f32 %v674_v30, %v646_v33  ;;  %v1647_v30 = vld [vmem:[#allocation7 + $0x18] sm:$0xff] }
  0xe3   : > { %v667_v17 = vpop.f32.mrf.mxu1  ;;  %v1659_v33 = vld [vmem:[#allocation7 + $0x78] sm:$0xff] }
  0xe4   : > { %v668_v18 = vadd.f32 %v667_v17, %v639_v15  ;;  %1220 = vmatpush.bf16.msrb.mxu0 %v1659_v33 }
  0xe7   : > { %v648_v0 = vpop.f32.mrf.mxu2 }
  0xe8   : > { %v677_v37 = vpop.f32.mrf.mxu3  ;;  %v649_v38 = vadd.f32 %v1760_v3, %v648_v0 }
  0xe9   : > { %v640_v19 = vpop.f32.mrf.mxu0 }
  0xea   : > { %v641_v22 = vadd.f32 %v1760_v3, %v640_v19  ;;  %v678_v39 = vadd.f32 %v677_v37, %v649_v38  ;;  %v1645_v37 = vld [vmem:[#allocation7 + $0x8] sm:$0xff] }
  0xeb   : > { %v669_v23 = vpop.f32.mrf.mxu1 }
  0xec   : > { %v670_v25 = vadd.f32 %v669_v23, %v641_v22 }
  0xef   : > { %v650_v4 = vpop.f32.mrf.mxu2 }
  0xf0   : > { %v651_v42 = vadd.f32 %v1760_v3, %v650_v4  ;;  %v679_v43 = vpop.f32.mrf.mxu3 }
  0xf2   : > { %v680_v44 = vadd.f32 %v679_v43, %v651_v42  ;;  %v1657_v42 = vld [vmem:[#allocation7 + $0x68] sm:$0xff] }
  0xf7   : > { %v691_v9 = vpop.f32.mrf.mxu2 }
  0xf8   : > { %v692_v10 = vadd.f32 %v691_v9, %v663_v7 }
  0xfa   : > { %711 = vadd.xlane.f32.xlu0 %v692_v10 }
  0xff   : > { %v693_v14 = vpop.f32.mrf.mxu2 }
 0x100   : > { %v694_v16 = vadd.f32 %v693_v14, %v665_v13 }
 0x102   : > { %713 = vadd.xlane.f32.xlu0 %v694_v16 }
 0x107   : > { %v696_v20 = vpop.f32.mrf.mxu2 }
 0x108   : > { %v697_v21 = vadd.f32 %v696_v20, %v668_v18 }
 0x10a   : > { %715 = vadd.xlane.f32.xlu1 %v697_v21 }
 0x10f   : > { %v698_v26 = vpop.f32.mrf.mxu2 }
 0x110   : > { %v699_v27 = vadd.f32 %v698_v26, %v670_v25  ;;  %v1651_v26 = vld [vmem:[#allocation7 + $0x38] sm:$0xff] }
 0x111   : > { %1191 = vmatpush.bf16.msrb.mxu3 %v1651_v26 }
 0x112   : > { %717 = vadd.xlane.f32.xlu1 %v699_v27 }
 0x117   : > { %v701_v31 = vpop.f32.mrf.mxu2 }
 0x118   : > { %v702_v32 = vadd.f32 %v701_v31, %v673_v29  ;;  %v1648_v29 = vld [vmem:[#allocation7 + $0x20] sm:$0xff]  ;;  %v1667_v31 = vld [vmem:[#allocation7 + $0xb8] sm:$0xff] }
 0x119   : > { %1249 = vmatpush.bf16.msrb.mxu1 %v1667_v31 }
 0x11a   : > { %719 = vadd.xlane.f32.xlu2 %v702_v32 }
 0x11f   : > { %v703_v35 = vpop.f32.mrf.mxu2 }
 0x120   : > { %v704_v36 = vadd.f32 %v703_v35, %v675_v34 }
 0x122   : > { %721 = vadd.xlane.f32.xlu2 %v704_v36 }
 0x127   : > { %v706_v40 = vpop.f32.mrf.mxu2 }
 0x128   : > { %v707_v41 = vadd.f32 %v706_v40, %v678_v39  ;;  %v1658_v39 = vld [vmem:[#allocation7 + $0x70] sm:$0xff]  ;;  %v1665_v40 = vld [vmem:[#allocation7 + $0xa8] sm:$0xff] }
 0x129   : > { %1221 = vmatpush.bf16.msrb.mxu0 %v1658_v39 }
 0x12a   : > { %723 = vadd.xlane.f32.xlu0 %v707_v41 }
 0x12d   : > { %1222 = vmatpush.bf16.msrb.mxu0 %v1657_v42 }
 0x12f   : > { %v708_v45 = vpop.f32.mrf.mxu2 }
 0x130   : > { %v709_v47 = vadd.f32 %v708_v45, %v680_v44  ;;  %v1664_v45 = vld [vmem:[#allocation7 + $0xa0] sm:$0xff] }
 0x131   : > { %1223 = vmatpush.bf16.msrb.mxu0 %v1656_v49 }
 0x132   : > { %725 = vadd.xlane.f32.xlu1 %v709_v47 }
 0x16d   : > { %v712_v50 = vpop.xlane.xlu0 %711 }
 0x16e   : > { %v727_v51 = vmul.f32 0.008928572, %v712_v50 }
 0x170   : > { %v738_v52 = vsub.f32 %v692_v10, %v727_v51  ;;  %v1663_v51 = vld [vmem:[#allocation7 + $0x98] sm:$0xff] }
 0x172   : > { %v2154_v53 = vsel %vm737_vm4, %v738_v52, 0.0 }
 0x173   : > { %v754_v54 = vmul.f32 %v2154_v53, %v2154_v53 }
 0x175   : > { %762 = vadd.xlane.f32.xlu2 %v754_v54  ;;  %v714_v55 = vpop.xlane.xlu0 %713  ;;  %v1655_v54 = vld [vmem:[#allocation7 + $0x58] sm:$0xff] }
 0x176   : > { %v728_v56 = vmul.f32 0.008928572, %v714_v55  ;;  %1224 = vmatpush.bf16.msrb.mxu0 %v1655_v54 }
 0x178   : > { %v739_v57 = vsub.f32 %v694_v16, %v728_v56 }
 0x17a   : > { %v2159_v58 = vsel %vm737_vm4, %v739_v57, 0.0 }
 0x17b   : > { %v755_v59 = vmul.f32 %v2159_v58, %v2159_v58 }
 0x17d   : > { %v716_v60 = vpop.xlane.xlu1 %715  ;;  %764 = vadd.xlane.f32.xlu0 %v755_v59  ;;  %v1662_v59 = vld [vmem:[#allocation7 + $0x90] sm:$0xff] }
 0x17e   : > { %v729_v61 = vmul.f32 0.008928572, %v716_v60 }
 0x180   : > { %v740_v62 = vsub.f32 %v697_v21, %v729_v61 }
 0x182   : > { %v2164_v63 = vsel %vm737_vm4, %v740_v62, 0.0 }
 0x183   : > { %v756_v0 = vmul.f32 %v2164_v63, %v2164_v63 }
 0x185   : > { %v718_v1 = vpop.xlane.xlu1 %717  ;;  %766 = vadd.xlane.f32.xlu1 %v756_v0  ;;  %v1654_v0 = vld [vmem:[#allocation7 + $0x50] sm:$0xff] }
 0x186   : > { %v730_v2 = vmul.f32 0.008928572, %v718_v1  ;;  %1225 = vmatpush.bf16.msrb.mxu0 %v1654_v0 }
 0x188   : > { %v741_v3 = vsub.f32 %v699_v27, %v730_v2  ;;  %v1650_v27 = vld [vmem:[#allocation7 + $0x30] sm:$0xff] }
 0x189   : > { %1192 = vmatpush.bf16.msrb.mxu3 %v1650_v27 }
 0x18a   : > { %v2169_v4 = vsel %vm737_vm4, %v741_v3, 0.0  ;;  %v1661_v3 = vld [vmem:[#allocation7 + $0x88] sm:$0xff] }
 0x18b   : > { %v757_v5 = vmul.f32 %v2169_v4, %v2169_v4 }
 0x18d   : > { %v720_v6 = vpop.xlane.xlu2 %719  ;;  %768 = vadd.xlane.f32.xlu2 %v757_v5  ;;  %1193 = vmatpush.bf16.msrb.mxu3 %v1649_v28 }
 0x18e   : > { %v731_v7 = vmul.f32 0.008928572, %v720_v6 }
 0x190   : > { %v742_v8 = vsub.f32 %v702_v32, %v731_v7  ;;  %v1646_v32 = vld [vmem:[#allocation7 + $0x10] sm:$0xff]  ;;  %v2196_v7 = vld [vmem:[%s2292_s3] ss:$0 sm:$0xff] }
 0x191   : > { %1194 = vmatpush.bf16.msrb.mxu3 %v1648_v29 }
 0x192   : > { %v2174_v9 = vsel %vm737_vm4, %v742_v8, 0.0 }
 0x193   : > { %v758_v10 = vmul.f32 %v2174_v9, %v2174_v9 }
 0x195   : > { %v722_v11 = vpop.xlane.xlu2 %721  ;;  %770 = vadd.xlane.f32.xlu0 %v758_v10  ;;  %1195 = vmatpush.bf16.msrb.mxu3 %v1647_v30  ;;  %v1653_v10 = vld [vmem:[#allocation7 + $0x48] sm:$0xff] }
 0x196   : > { %v732_v12 = vmul.f32 0.008928572, %v722_v11  ;;  %1226 = vmatpush.bf16.msrb.mxu0 %v1653_v10 }
 0x198   : > { %v743_v13 = vsub.f32 %v704_v36, %v732_v12  ;;  %v1666_v36 = vld [vmem:[#allocation7 + $0xb0] sm:$0xff] }
 0x199   : > { %1196 = vmatpush.bf16.msrb.mxu3 %v1646_v32  ;;  %1250 = vmatpush.bf16.msrb.mxu1 %v1666_v36 }
 0x19a   : > { %v2179_v14 = vsel %vm737_vm4, %v743_v13, 0.0 }
 0x19b   : > { %v759_v15 = vmul.f32 %v2179_v14, %v2179_v14 }
 0x19d   : > { %772 = vadd.xlane.f32.xlu1 %v759_v15  ;;  %v724_v16 = vpop.xlane.xlu0 %723  ;;  %1197 = vmatpush.bf16.msrb.mxu3 %v1645_v37  ;;  %v1660_v15 = vld [vmem:[#allocation7 + $0x80] sm:$0xff] }
 0x19e   : > { %v733_v17 = vmul.f32 0.008928572, %v724_v16  ;;  %1251 = vmatpush.bf16.msrb.mxu1 %v1665_v40 }
 0x1a0   : > { %v744_v18 = vsub.f32 %v707_v41, %v733_v17  ;;  %v1644_v41 = vld [vmem:[#allocation7] sm:$0xff] }
 0x1a1   : > { %1198 = vmatpush.bf16.msrb.mxu3 %v1644_v41 }
 0x1a2   : > { %v2184_v19 = vsel %vm737_vm4, %v744_v18, 0.0  ;;  %1252 = vmatpush.bf16.msrb.mxu1 %v1664_v45 }
 0x1a3   : > { %v760_v20 = vmul.f32 %v2184_v19, %v2184_v19 }
 0x1a5   : > { %v726_v21 = vpop.xlane.xlu1 %725  ;;  %774 = vadd.xlane.f32.xlu2 %v760_v20 }
 0x1a6   : > { %v734_v22 = vmul.f32 0.008928572, %v726_v21  ;;  %1253 = vmatpush.bf16.msrb.mxu1 %v1663_v51  ;;  %v2203_v21 = vld [vmem:[%s2293_s4] ss:$0 sm:$0xff] }
 0x1a8   : > { %v745_v23 = vsub.f32 %v709_v47, %v734_v22 }
 0x1aa   : > { %v2189_v24 = vsel %vm737_vm4, %v745_v23, 0.0  ;;  %1254 = vmatpush.bf16.msrb.mxu1 %v1662_v59 }
 0x1ab   : > { %v761_v25 = vmul.f32 %v2189_v24, %v2189_v24 }
 0x1ad   : > { %776 = vadd.xlane.f32.xlu0 %v761_v25 }
 0x1ae   : > { %1255 = vmatpush.bf16.msrb.mxu1 %v1661_v3 }
 0x1b2   : > { %1256 = vmatpush.bf16.msrb.mxu1 %v1660_v15 }
 0x1e8   : > { %v763_v34 = vpop.xlane.xlu2 %762 }
 0x1e9   : > { %v778_v35 = vmul.f32 0.008928572, %v763_v34 }
 0x1eb   : > { %v786_v38 = vadd.f32 1e-05, %v778_v35 }
 0x1ed   : > { %1764 = vrsqrt.f32 %v786_v38  ;;  %vm800_vm6 = vweird.f32 %v786_v38 }
 0x1f0   : > { %v765_v43 = vpop.xlane.xlu0 %764 }
 0x1f1   : > { %v779_v44 = vmul.f32 0.008928572, %v765_v43 }
 0x1f3   : > { %v1765_v47 = vpop.eup %1764  ;;  %v787_v48 = vadd.f32 1e-05, %v779_v44 }
 0x1f4   : > { %v795_v50 = vmul.f32 %v1765_v47, %v786_v38  ;;  %vm801_vm5 = vweird.f32 %v1765_v47 }
 0x1f5   : > { %1766 = vrsqrt.f32 %v787_v48  ;;  %vm802_vm7 = vmor %vm800_vm6, %vm801_vm5  ;;  %vm810_vm9 = vweird.f32 %v787_v48 }
 0x1f6   : > { %v796_v52 = vmul.f32 %v1765_v47, %v795_v50 }
 0x1f8   : > { %v797_v55 = vmul.f32 0.5, %v796_v52  ;;  %v767_v56 = vpop.xlane.xlu1 %766 }
 0x1f9   : > { %v780_v57 = vmul.f32 0.008928572, %v767_v56 }
 0x1fa   : > { %v798_v60 = vsub.f32 1.5, %v797_v55 }
 0x1fb   : > { %v1767_v61 = vpop.eup %1766  ;;  %v788_v62 = vadd.f32 1e-05, %v780_v57 }
 0x1fc   : > { %v799_v1 = vmul.f32 %v1765_v47, %v798_v60  ;;  %v805_v2 = vmul.f32 %v1767_v61, %v787_v48  ;;  %vm811_vm8 = vweird.f32 %v1767_v61 }
 0x1fd   : > { %1768 = vrsqrt.f32 %v788_v62  ;;  %vm812_vm10 = vmor %vm810_vm9, %vm811_vm8  ;;  %vm820_vm12 = vweird.f32 %v788_v62 }
 0x1fe   : > { %v803_v5 = vsel %vm802_vm7, %v1765_v47, %v799_v1  ;;  %v806_v6 = vmul.f32 %v1767_v61, %v805_v2 }
 0x1ff   : > { %v874_v8 = vmul.f32 %v803_v5, %v2154_v53  ;;  %v1652_v53 = vld [vmem:[#allocation7 + $0x40] sm:$0xff] }
 0x200   : > { %v807_v11 = vmul.f32 0.5, %v806_v6  ;;  %v769_v12 = vpop.xlane.xlu2 %768  ;;  %1227 = vmatpush.bf16.msrb.mxu0 %v1652_v53 }
 0x201   : > { %v781_v13 = vmul.f32 0.008928572, %v769_v12  ;;  %v886_v18 = vmul.f32 %v2196_v7, %v874_v8 }
 0x202   : > { %v808_v16 = vsub.f32 1.5, %v807_v11 }
 0x203   : > { %v1769_v17 = vpop.eup %1768  ;;  %v789_v20 = vadd.f32 1e-05, %v781_v13  ;;  %v898_v28 = vadd.f32 %v2203_v21, %v886_v18 }
 0x204   : > { %v809_v22 = vmul.f32 %v1767_v61, %v808_v16  ;;  %v815_v23 = vmul.f32 %v1769_v17, %v788_v62  ;;  %vm821_vm11 = vweird.f32 %v1769_v17 }
 0x205   : > { %1770 = vrsqrt.f32 %v789_v20  ;;  %v906_v37 = vpack.c.bf16 %v898_v28, %v898_v28  ;;  %vm822_vm13 = vmor %vm820_vm12, %vm821_vm11  ;;  %vm830_vm15 = vweird.f32 %v789_v20 }
 0x206   : > { %v813_v25 = vsel %vm812_vm10, %v1767_v61, %v809_v22  ;;  %v816_v26 = vmul.f32 %v1769_v17, %v815_v23 }
 0x207   : > { %v875_v27 = vmul.f32 %v813_v25, %v2159_v58  ;;  %v2210_v43 = vunpack.c.l.b16 %v906_v37 }
 0x208   : > { %v817_v29 = vmul.f32 0.5, %v816_v26  ;;  %v771_v30 = vpop.xlane.xlu0 %770 }
 0x209   : > { %v887_v31 = vmul.f32 %v2196_v7, %v875_v27  ;;  %v782_v32 = vmul.f32 0.008928572, %v771_v30 }
 0x20a   : > { %v818_v33 = vsub.f32 1.5, %v817_v29 }
 0x20b   : > { %v1771_v34 = vpop.eup %1770  ;;  %v790_v35 = vadd.f32 1e-05, %v782_v32  ;;  %v899_v36 = vadd.f32 %v2203_v21, %v887_v31 }
 0x20c   : > { %v819_v38 = vmul.f32 %v1769_v17, %v818_v33  ;;  %v825_v39 = vmul.f32 %v1771_v34, %v789_v20  ;;  %vm831_vm14 = vweird.f32 %v1771_v34 }
 0x20d   : > { %1772 = vrsqrt.f32 %v790_v35  ;;  %v907_v58 = vpack.c.bf16 %v899_v36, %v899_v36  ;;  %vm832_vm1 = vmor %vm830_vm15, %vm831_vm14  ;;  %vm840_vm5 = vweird.f32 %v790_v35 }
 0x20e   : > { %v823_v40 = vsel %vm822_vm13, %v1769_v17, %v819_v38  ;;  %v826_v41 = vmul.f32 %v1771_v34, %v825_v39 }
 0x20f   : > { %v876_v42 = vmul.f32 %v823_v40, %v2164_v63  ;;  %v923_v44 = vunpack.c.l.b16 %v907_v58 }
 0x210   : > { %v827_v45 = vmul.f32 0.5, %v826_v41  ;;  %v773_v47 = vpop.xlane.xlu1 %772 }
 0x211   : > { %v783_v48 = vmul.f32 0.008928572, %v773_v47  ;;  %v930_v49 = vpack.c.b16 %v923_v44, %v2210_v43  ;;  %v888_v52 = vmul.f32 %v2196_v7, %v876_v42 }
 0x212   : > { %v828_v50 = vsub.f32 1.5, %v827_v45 }
 0x213   : > { %v1773_v51 = vpop.eup %1772  ;;  %v791_v54 = vadd.f32 1e-05, %v783_v48  ;;  %1199 = vmatmul.bf16.vlgmr.msrb.gmra.mxu3 %v930_v49  ;;  %v900_v60 = vadd.f32 %v2203_v21, %v888_v52  ;;  %v937_v12 = vshll.u32 %v930_v49, 16  ;;  %v976_v27 = vrot.slane %v930_v49, 1 }
 0x214   : > { %v829_v55 = vmul.f32 %v1771_v34, %v828_v50  ;;  %v835_v56 = vmul.f32 %v1773_v51, %v790_v35  ;;  %vm841_vm4 = vweird.f32 %v1773_v51  ;;  %v935_v28 = vshrl.u32 %v930_v49, 16 }
 0x215   : > { %1774 = vrsqrt.f32 %v791_v54  ;;  %v908_v8 = vpack.c.bf16 %v900_v60, %v900_v60  ;;  %vm842_vm6 = vmor %vm840_vm5, %vm841_vm4  ;;  %v939_v25 = vrot.slane %v937_v12, 1  ;;  %vm850_vm8 = vweird.f32 %v791_v54 }
 0x216   : > { %v833_v63 = vsel %vm832_vm1, %v1771_v34, %v829_v55  ;;  %v836_v57 = vmul.f32 %v1773_v51, %v835_v56 }
 0x217   : > { %v877_v59 = vmul.f32 %v833_v63, %v2169_v4  ;;  %v924_v17 = vunpack.c.l.b16 %v908_v8  ;;  %v940_v36 = vor.u32 %v939_v25, %v935_v28 }
 0x218   : > { %v837_v61 = vmul.f32 0.5, %v836_v57  ;;  %v775_v62 = vpop.xlane.xlu2 %774 }
 0x219   : > { %v889_v0 = vmul.f32 %v2196_v7, %v877_v59  ;;  %v784_v1 = vmul.f32 0.008928572, %v775_v62 }
 0x21a   : > { %v838_v2 = vsub.f32 1.5, %v837_v61 }
 0x21b   : > { %v1775_v3 = vpop.eup %1774  ;;  %v792_v5 = vadd.f32 1e-05, %v784_v1  ;;  %v901_v6 = vadd.f32 %v2203_v21, %v889_v0 }
 0x21c   : > { %v839_v10 = vmul.f32 %v1773_v51, %v838_v2  ;;  %v845_v11 = vmul.f32 %v1775_v3, %v791_v54  ;;  %vm851_vm7 = vweird.f32 %v1775_v3 }
 0x21d   : > { %1776 = vrsqrt.f32 %v792_v5  ;;  %v909_v4 = vpack.c.bf16 %v901_v6, %v901_v6  ;;  %vm852_vm9 = vmor %vm850_vm8, %vm851_vm7  ;;  %vm860_vm11 = vweird.f32 %v792_v5 }
 0x21e   : > { %v843_v13 = vsel %vm842_vm6, %v1773_v51, %v839_v10  ;;  %v846_v15 = vmul.f32 %v1775_v3, %v845_v11 }
 0x21f   : > { %v878_v16 = vmul.f32 %v843_v13, %v2174_v9  ;;  %v925_v18 = vunpack.c.l.b16 %v909_v4 }
 0x220   : > { %v847_v20 = vmul.f32 0.5, %v846_v15  ;;  %v777_v53 = vpop.xlane.xlu0 %776 }
 0x221   : > { %v785_v22 = vmul.f32 0.008928572, %v777_v53  ;;  %v931_v23 = vpack.c.b16 %v925_v18, %v924_v17  ;;  %v890_v30 = vmul.f32 %v2196_v7, %v878_v16 }
 0x222   : > { %v848_v26 = vsub.f32 1.5, %v847_v20 }
 0x223   : > { %v1777_v29 = vpop.eup %1776  ;;  %v793_v31 = vadd.f32 1e-05, %v785_v22  ;;  %1204 = vmatmul.bf16.gmra.mxu3 %v931_v23  ;;  %v977_v32 = vrot.slane %v931_v23, 1  ;;  %v942_v33 = vshll.u32 %v931_v23, 16  ;;  %v902_v41 = vadd.f32 %v2203_v21, %v890_v30 }
 0x224   : > { %v849_v34 = vmul.f32 %v1775_v3, %v848_v26  ;;  %v855_v9 = vmul.f32 %v1777_v29, %v792_v5  ;;  %vm861_vm10 = vweird.f32 %v1777_v29  ;;  %v946_v0 = vshrl.u32 %v931_v23, 16 }
 0x225   : > { %1778 = vrsqrt.f32 %v793_v31  ;;  %v978_v35 = vsel %vm407_vm3, %v976_v27, %v977_v32  ;;  %v944_v37 = vrot.slane %v942_v33, 1  ;;  %v910_v49 = vpack.c.bf16 %v902_v41, %v902_v41  ;;  %vm862_vm12 = vmor %vm860_vm11, %vm861_vm10 }
 0x226   : > { %v853_v38 = vsel %vm852_vm9, %v1775_v3, %v849_v34  ;;  %v856_v39 = vmul.f32 %v1777_v29, %v855_v9  ;;  %1257 = vmatmul.bf16.vlgmr.msrb.gmra.mxu1 %v978_v35  ;;  %vm870_vm14 = vweird.f32 %v793_v31  ;;  %v1763_v9 = vld [vmem:[%s2295_s6] ss:$0 sm:$0xff] }
 0x227   : > { %v879_v58 = vmul.f32 %v853_v38, %v2179_v14  ;;  %v945_v40 = vsel %vm362_vm0, %v940_v36, %v944_v37  ;;  %v926_v56 = vunpack.c.l.b16 %v910_v49  ;;  %v948_v5 = vor.u32 %v946_v0, %v944_v37 }
 0x228   : > { %v857_v42 = vmul.f32 0.5, %v856_v39  ;;  %1228 = vmatmul.bf16.vlgmr.msrb.gmra.mxu0 %v945_v40 }
 0x229   : > { %v891_v44 = vmul.f32 %v2196_v7, %v879_v58 }
 0x22a   : > { %v858_v45 = vsub.f32 1.5, %v857_v42 }
 0x22b   : > { %v1779_v47 = vpop.eup %1778  ;;  %v903_v48 = vadd.f32 %v2203_v21, %v891_v44 }
 0x22c   : > { %v859_v50 = vmul.f32 %v1777_v29, %v858_v45  ;;  %v865_v51 = vmul.f32 %v1779_v47, %v793_v31  ;;  %vm871_vm13 = vweird.f32 %v1779_v47 }
 0x22d   : > { %v911_v52 = vpack.c.bf16 %v903_v48, %v903_v48  ;;  %vm872_vm15 = vmor %vm870_vm14, %vm871_vm13 }
 0x22e   : > { %v863_v14 = vsel %vm862_vm12, %v1777_v29, %v859_v50  ;;  %v866_v54 = vmul.f32 %v1779_v47, %v865_v51 }
 0x22f   : > { %v880_v55 = vmul.f32 %v863_v14, %v2184_v19  ;;  %v927_v63 = vunpack.c.l.b16 %v911_v52 }
 0x230   : > { %v867_v57 = vmul.f32 0.5, %v866_v54 }
 0x231   : > { %v932_v59 = vpack.c.b16 %v927_v63, %v926_v56  ;;  %v892_v61 = vmul.f32 %v2196_v7, %v880_v55 }
 0x232   : > { %v868_v60 = vsub.f32 1.5, %v867_v57 }
 0x233   : > { %1209 = vmatmul.bf16.gmra.mxu3 %v932_v59  ;;  %v979_v62 = vrot.slane %v932_v59, 1  ;;  %v950_v1 = vshll.u32 %v932_v59, 16  ;;  %v904_v11 = vadd.f32 %v2203_v21, %v892_v61  ;;  %v954_v53 = vshrl.u32 %v932_v59, 16 }
 0x234   : > { %v869_v2 = vmul.f32 %v1779_v47, %v868_v60 }
 0x235   : > { %v980_v3 = vsel %vm407_vm3, %v977_v32, %v979_v62  ;;  %v952_v6 = vrot.slane %v950_v1, 1  ;;  %v912_v13 = vpack.c.bf16 %v904_v11, %v904_v11 }
 0x236   : > { %v873_v19 = vsel %vm872_vm15, %v1779_v47, %v869_v2  ;;  %1262 = vmatmul.bf16.gmra.mxu1 %v980_v3 }
 0x237   : > { %v881_v8 = vmul.f32 %v873_v19, %v2189_v24  ;;  %v953_v10 = vsel %vm362_vm0, %v948_v5, %v952_v6  ;;  %v928_v16 = vunpack.c.l.b16 %v912_v13  ;;  %v956_v23 = vor.u32 %v954_v53, %v952_v6 }
 0x238   : > { %1233 = vmatmul.bf16.gmra.mxu0 %v953_v10 }
 0x239   : > { %v893_v4 = vmul.f32 %v2196_v7, %v881_v8  ;;  %v969_v7 = vpack.c.b16 %v2210_v43, %v2210_v43 }
 0x23b   : > { %v905_v12 = vadd.f32 %v2203_v21, %v893_v4  ;;  %v971_v27 = vshll.u32 %v969_v7, 16  ;;  %v986_v28 = vrot.slane %v969_v7, 1 }
 0x23d   : > { %v913_v15 = vpack.c.bf16 %v905_v12, %v905_v12  ;;  %v973_v31 = vrot.slane %v971_v27, 1 }
 0x23f   : > { %v929_v17 = vunpack.c.l.b16 %v913_v15 }
 0x241   : > { %v933_v18 = vpack.c.b16 %v929_v17, %v928_v16 }
 0x243   : > { %1214 = vmatmul.bf16.gmra.mxu3 %v933_v18  ;;  %v981_v20 = vrot.slane %v933_v18, 1  ;;  %v958_v22 = vshll.u32 %v933_v18, 16  ;;  %v962_v21 = vshrl.u32 %v933_v18, 16 }
 0x245   : > { %v982_v24 = vsel %vm407_vm3, %v979_v62, %v981_v20  ;;  %v960_v25 = vrot.slane %v958_v22, 1  ;;  %v989_v30 = vsel %vm407_vm3, %v981_v20, %v986_v28 }
 0x246   : > { %1267 = vmatmul.bf16.gmra.mxu1 %v982_v24 }
 0x247   : > { %v961_v26 = vsel %vm362_vm0, %v956_v23, %v960_v25  ;;  %v964_v29 = vor.u32 %v962_v21, %v960_v25 }
 0x248   : > { %1238 = vmatmul.bf16.gmra.mxu0 %v961_v26 }
 0x249   : > { %v975_v32 = vsel %vm2133_vm2, %v964_v29, %v973_v31 }
 0x256   : > { %1272 = vmatmul.bf16.gmra.mxu1 %v989_v30 }
 0x258   : > { %1243 = vmatmul.bf16.gmra.mxu0 %v975_v32 }
 0x296   : > { %v1200_v33 = vpop.f32.mrf.mxu3 }
 0x297   : > { %v1201_v43 = vadd.f32 %v1763_v9, %v1200_v33 }
 0x29e   : > { %v1202_v34 = vpop.f32.mrf.mxu3 }
 0x29f   : > { %v1203_v58 = vadd.f32 %v1763_v9, %v1202_v34 }
 0x2a3   : > { %v1258_v35 = vpop.f32.mrf.mxu1 }
 0x2a5   : > { %v1229_v36 = vpop.f32.mrf.mxu0 }
 0x2a6   : > { %v1230_v37 = vadd.f32 %v1229_v36, %v1201_v43  ;;  %v1205_v38 = vpop.f32.mrf.mxu3 }
 0x2a7   : > { %v1206_v47 = vadd.f32 %v1763_v9, %v1205_v38 }
 0x2a8   : > { %v1259_v39 = vadd.f32 %v1258_v35, %v1230_v37 }
 0x2aa   : > { %1278 = vst [vmem:[%s2245_s11] sm:$0xff] %v1259_v39 }
 0x2ab   : > { %v1260_v46 = vpop.f32.mrf.mxu1 }
 0x2ad   : > { %v1231_v40 = vpop.f32.mrf.mxu0 }
 0x2ae   : > { %v1232_v41 = vadd.f32 %v1231_v40, %v1203_v58  ;;  %v1207_v44 = vpop.f32.mrf.mxu3 }
 0x2af   : > { %v1208_v14 = vadd.f32 %v1763_v9, %v1207_v44 }
 0x2b0   : > { %v1261_v42 = vadd.f32 %v1260_v46, %v1232_v41 }
 0x2b2   : > { %1279 = vst [vmem:[%s2245_s11 + $0x8] sm:$0xff] %v1261_v42 }
 0x2b3   : > { %v1263_v45 = vpop.f32.mrf.mxu1 }
 0x2b5   : > { %v1234_v48 = vpop.f32.mrf.mxu0 }
 0x2b6   : > { %v1235_v49 = vadd.f32 %v1234_v48, %v1206_v47  ;;  %v1210_v51 = vpop.f32.mrf.mxu3 }
 0x2b7   : > { %v1211_v57 = vadd.f32 %v1763_v9, %v1210_v51 }
 0x2b8   : > { %v1264_v50 = vadd.f32 %v1263_v45, %v1235_v49 }
 0x2ba   : > { %1280 = vst [vmem:[%s2245_s11 + $0x10] sm:$0xff] %v1264_v50 }
 0x2bb   : > { %v1265_v52 = vpop.f32.mrf.mxu1 }
 0x2bd   : > { %v1236_v54 = vpop.f32.mrf.mxu0 }
 0x2be   : > { %v1237_v55 = vadd.f32 %v1236_v54, %v1208_v14  ;;  %v1212_v59 = vpop.f32.mrf.mxu3 }
 0x2bf   : > { %v1213_v1 = vadd.f32 %v1763_v9, %v1212_v59 }
 0x2c0   : > { %v1266_v56 = vadd.f32 %v1265_v52, %v1237_v55 }
 0x2c2   : > { %1281 = vst [vmem:[%s2245_s11 + $0x18] sm:$0xff] %v1266_v56 }
 0x2c3   : > { %v1268_v63 = vpop.f32.mrf.mxu1 }
 0x2c5   : > { %v1239_v60 = vpop.f32.mrf.mxu0 }
 0x2c6   : > { %v1240_v61 = vadd.f32 %v1239_v60, %v1211_v57  ;;  %v1215_v5 = vpop.f32.mrf.mxu3 }
 0x2c7   : > { %v1216_v19 = vadd.f32 %v1763_v9, %v1215_v5 }
 0x2c8   : > { %v1269_v62 = vadd.f32 %v1268_v63, %v1240_v61 }
 0x2ca   : > { %1282 = vst [vmem:[%s2245_s11 + $0x20] sm:$0xff] %v1269_v62 }
 0x2cb   : > { %v1270_v0 = vpop.f32.mrf.mxu1 }
 0x2cd   : > { %v1241_v2 = vpop.f32.mrf.mxu0 }
 0x2ce   : > { %v1242_v3 = vadd.f32 %v1241_v2, %v1213_v1  ;;  %v1217_v12 = vpop.f32.mrf.mxu3 }
 0x2cf   : > { %v1218_v13 = vadd.f32 %v1763_v9, %v1217_v12 }
 0x2d0   : > { %v1271_v6 = vadd.f32 %v1270_v0, %v1242_v3 }
 0x2d2   : > { %1283 = vst [vmem:[%s2245_s11 + $0x28] sm:$0xff] %v1271_v6 }
 0x2d3   : > { %v1273_v8 = vpop.f32.mrf.mxu1 }
 0x2d5   : > { %v1244_v10 = vpop.f32.mrf.mxu0 }
 0x2d6   : > { %v1245_v11 = vadd.f32 %v1244_v10, %v1216_v19 }
 0x2d8   : > { %v1274_v4 = vadd.f32 %v1273_v8, %v1245_v11 }
 0x2da   : > { %1284 = vst [vmem:[%s2245_s11 + $0x30] sm:$0xff] %v1274_v4 }
 0x2db   : > { %v1275_v17 = vpop.f32.mrf.mxu1 }
 0x2dd   : > { %v1246_v15 = vpop.f32.mrf.mxu0 }
 0x2de   : > { %v1247_v16 = vadd.f32 %v1246_v15, %v1218_v13 }
 0x2e0   : > { %v1276_v18 = vadd.f32 %v1275_v17, %v1247_v16 }
 0x2e2   : > { %1285 = vst [vmem:[%s2245_s11 + $0x38] sm:$0xff] %v1276_v18 }
 0x2e3   : > { %1897 = shalt.err (!%p1894_p10)
}
 0x2e4   : > { %s1946_s14 = smov 128   ;;  %s1947_s11 = smov 8  }
 0x2e5   : > { %1699 = dma.vmem_to_hbm [thread:$0]  (%p2060_p3), %s1300_s30, 1024, %s1302_s12, %s1287_s18, %s1946_s14, %s1946_s14, %s1947_s11  }
 0x2e6 PF: > { %s1316_s20 = sand.u32 1, %s1928_s24   ;;  %p2310_p12 = scmp.ge.s32.totalorder %s1940_s27, 2 }
 0x2e7   : > { %s1317_s19 = scalar_lea.sflag [#allocation4], %s1316_s20 }
 0x2e8   : > { %p1713_p13 = pnand %p2310_p12, %p2023_p6 }
 0x2ea   : > { %p1714_p0 = pneg %p1713_p13 }
 0x2ec   : > { %1923 = dma.done.wait (%p1714_p0), %s1317_s19, 1024  }
 0x2ed   : > { %1925 = vsyncadd (%p1714_p0), %s1317_s19, 4294966272  ;;  %p21_p5 = scmp.ge.s32.totalorder %s2050_s22, 4   ;;  %s2311_s24 = smov %s1932_s25 }
 0x2ee   : > { %s2312_s25 = smov %s1936_s26  ;;  %s2313_s26 = smov %s2066_s10 }
 0x2ef   : > { %s2314_s27 = smov %s2050_s22  ;;  %23 = sbr.rel (!%p21_p5) target bundleno = 8 (0x8), region = 101 }
 0x2f4   :  { %1323 = vsyncpa [#allocation3], 1 }
 0x2f5   :  { %1325 = vsyncpa [#allocation3 + $0x1], 1 }
 0x2f6   :  { %1326 = vsyncpa [#allocation6], 1 }
 0x2f7   :  { %1327 = vsyncpa [#allocation4], 1 }
 0x2f8   :  { %1329 = vsyncpa [#allocation4 + $0x1], 1 }

// kernel: tpu_custom_call.1
= control target key start
LH: loop header
LB: loop body
LE: loop exit
PB: predicated region body
PF: predicated region fallthrough
CT: control target
= control target key end

     0   :  { %s2289_s0 = inlined_call_operand.hbm [shape: bf16[128,128], index: 0, kind: input, shape index: {}]   ;;  %s2290_s1 = inlined_call_operand.hbm [shape: bf16[384,128], index: 1, kind: input, shape index: {}]   ;;  %s2291_s2 = inlined_call_operand.vmem [shape: f32[1,128], index: 2, kind: input, shape index: {}]   ;;  %s2292_s3 = inlined_call_operand.vmem [shape: f32[1,128], index: 3, kind: input, shape index: {}]   ;;  %s2293_s4 = inlined_call_operand.vmem [shape: f32[1,128], index: 4, kind: input, shape index: {}]   ;;  %s2294_s5 = inlined_call_operand.hbm [shape: bf16[384,128], index: 5, kind: input, shape index: {}]   ;;  %s2295_s6 = inlined_call_operand.vmem [shape: f32[1,128], index: 6, kind: input, shape index: {}]   ;;  %s2296_s7 = inlined_call_operand.hbm [shape: f32[128,128], index: 7, kind: output, shape index: {}]  }
   0x1   :  { %2299 = sst [smem:[#allocation12_spill]] %s2290_s1 }
   0x2   :  { %12 = vsyncpa [#allocation3], 0 }
   0x3   :  { %14 = vsyncpa [#allocation3 + $0x1], 0 }
   0x4   :  { %15 = vsyncpa [#allocation6], 0 }
   0x5   :  { %16 = vsyncpa [#allocation4], 0 }
   0x6   :  { %18 = vsyncpa [#allocation4 + $0x1], 0  ;;  %s1988_s24 = smov 0   ;;  %s1990_s25 = smov 0  }
   0x7   :  { %s1992_s26 = smov 0   ;;  %s1994_s27 = smov 0  }
   0x8 LB: > { %s2009_s28 = sadd.s32 4294967295, %s1940_s27   ;;  %s1394_s29 = sadd.s32 4294967294, %s1940_s27   ;;  %s1940_s27 = sphi %s1994_s27, %s2314_s27   ;;  %s1936_s26 = sphi %s1992_s26, %s2313_s26   ;;  %s1932_s25 = sphi %s1990_s25, %s2312_s25   ;;  %s1928_s24 = sphi %s1988_s24, %s2311_s24  }
   0x9   : > { %p44_p0 = scmp.ne.s32.totalorder %s1932_s25, %s1928_s24  ;;  %p45_p1 = scmp.eq.s32.totalorder %s2009_s28, 0 }
   0xa   : > { %p194_p2 = scmp.eq.s32.totalorder %s2009_s28, 1  ;;  %p200_p3 = scmp.eq.s32.totalorder %s1394_s29, 1 }
   0xb   : > { %p2018_p4 = por %p45_p1, %p44_p0  ;;  %p1395_p5 = scmp.ge.s32.totalorder %s1940_s27, 1 }
   0xc   : > { %p2023_p6 = por %p200_p3, %p44_p0  ;;  %p207_p7 = scmp.lt.s32.totalorder %s1940_s27, 3 }
   0xd   : > { %s2302_s1 = sld [smem:[#allocation12_spill]]  ;;  %s1942_s13 = smov [#allocation5]  }
   0xe   : > { %p2031_p8 = pnand %p1395_p5, %p207_p7  ;;  %s220_s14 = sshll.u32 %s1942_s13, 4  ;;  %s221_s14 = int_to_ptr.vmem [resolvable:$true] %s220_s14 }
   0xf   : > { %s241_s17 = sshll.u32 %s2294_s5, 4  ;;  %s2297_s18 = smov 64   ;;  %s242_s17 = int_to_ptr.hbm [resolvable:$true] %s241_s17 }
  0x10   : > { %p1701_p9 = pneg %p2031_p8  ;;  %s2298_s19 = smov 4  }
  0x11   : > { %s1945_s20 = smov [#allocation7]   ;;  %s2050_s22 = sadd.s32 1, %s1940_s27  }
  0x12   : > { %p1702_p10 = pnand %p1701_p9, %p45_p1  ;;  %s243_s21 = sshll.u32 %s1945_s20, 4  ;;  %s244_s21 = int_to_ptr.vmem [resolvable:$true] %s243_s21 }
  0x13   : > { %s218_s11 = sshll.u32 %s2302_s1, 4  ;;  %s31_s23 = sadd.s32 1, %s1936_s26  ;;  %s219_s11 = int_to_ptr.hbm [resolvable:$true] %s218_s11 }
  0x14   : > { %1704 = dma.hbm_to_vmem [thread:$0]  (!%p1702_p10), %s219_s11, 3072, %s221_s14, [#allocation6], %s2297_s18, %s2297_s18, %s2298_s19  }
  0x15   : > { %1707 = dma.hbm_to_vmem [thread:$0]  (!%p1702_p10), %s242_s17, 3072, %s244_s21, [#allocation6], %s2297_s18, %s2297_s18, %s2298_s19  }
  0x16   : > { %s28_s29 = ssub.s32 %s1940_s27, %s2050_s22  ;;  %p38_p12 = scmp.ne.s32.totalorder %s1936_s26, %s1932_s25 }
  0x17   : > { %p29_p13 = scmp.eq.s32.totalorder %s28_s29, 0  ;;  %p39_p0 = scmp.eq.s32.totalorder %s1940_s27, 0 }
  0x18   : > { %p2060_p3 = por %p194_p2, %p38_p12  ;;  %p1718_p5 = scmp.lt.s32.totalorder %s1940_s27, 2 }
  0x19   : > { %s2066_s10 = scalar_select %p29_p13, %s1936_s26, %s31_s23  }
  0x1a   : > { %p40_p7 = por %p39_p0, %p38_p12  ;;  %s260_s11 = sand.u32 1, %s1936_s26  }
  0x1b   : > { %s1399_s13 = sshll.u32 %s260_s11, 5  ;;  %s1616_s14 = sshll.u32 %s1940_s27, 5 }
  0x1c   : > { %s269_s17 = scalar_lea.hbm %s2289_s0, %s1616_s14  ;;  %s264_s20 = scalar_lea.vmem [#allocation2], %s1399_s13 }
  0x1d   : > { %s272_s21 = sshll.u32 %s264_s20, 4  ;;  %s270_s29 = sshll.u32 %s269_s17, 4  ;;  %s273_s21 = int_to_ptr.vmem [resolvable:$true] %s272_s21  ;;  %s271_s29 = int_to_ptr.hbm [resolvable:$true] %s270_s29 }
  0x1e   : > { %p2073_p2 = pnand %p1718_p5, %p40_p7  ;;  %s261_s23 = scalar_lea.sflag [#allocation3], %s260_s11 }
  0x1f   : > { %s1840_s19 = sshra.s32 %s271_s29, 4  ;;  %s1847_s15 = scalar_lea.hbm %s2289_s0, 64  ;;  %s1841_s19 = int_to_ptr.hbm [resolvable:$true] %s1840_s19 }
  0x20   : > { %s1842_s1 = scalar_lea.hbm %s1841_s19, 32  ;;  %p1844_p10 = pneg %p2073_p2 }
  0x21   : > { %p1843_p9 = scmp.ne.s32.totalorder %s1841_s19, %s1842_s1  ;;  %p1848_p0 = scmp.lt.s32.totalorder %s1841_s19, %s2289_s0 }
  0x22   : > { %p1849_p5 = scmp.lt.s32.totalorder %s1847_s15, %s1842_s1 }
  0x23   : > { %p1845_p12 = pnand %p1844_p10, %p1843_p9 }
  0x24   : > { %p1850_p7 = por %p1849_p5, %p1848_p0 }
  0x25   : > { %p1846_p13 = pneg %p1845_p12 }
  0x27   : > { %p1851_p11 = pnand %p1850_p7, %p1846_p13 }
  0x29   : > { %1854 = shalt.err (!%p1851_p11)
}
  0x2a   : > { %s2306_s11 = smov 4   ;;  %s2307_s20 = smov 64  }
  0x2b   : > { %1711 = dma.hbm_to_vmem [thread:$0]  (!%p2073_p2), %s271_s29, 512, %s273_s21, %s261_s23, %s2307_s20, %s2307_s20, %s2306_s11  }
  0x2c   : > { %284 = sbr.rel (%p2031_p8) target bundleno = 742 (0x2e6), region = 48  ;;  %s2093_s14 = sand.u32 (!%p2031_p8), 1, %s1932_s25  }
  0x2d   : > { %s1403_s19 = sshll.u32 (!%p2031_p8), %s2093_s14, 5  ;;  %s287_s1 = scalar_lea.sflag (!%p2031_p8), [#allocation3], %s2093_s14 }
  0x2e   : > { %s2097_s13 = scalar_lea.vmem (!%p2031_p8), [#allocation2], %s1403_s19 }
  0x31   : > { %1915 = dma.done.wait (%p2018_p4), %s287_s1, 512  }
  0x32   : > { %1917 = vsyncadd (%p2018_p4), %s287_s1, 4294966784 }
  0x33   : > { %1919 = dma.done.wait (%p45_p1), [#allocation6], 6144  }
  0x34   : > { %1921 = vsyncadd (%p45_p1), [#allocation6], 4294961152  ;;  %v1627_v0 = vld [vmem:[#allocation5 + $0x38] sm:$0xff]  ;;  %v1626_v2 = vld [vmem:[#allocation5 + $0x30] sm:$0xff]  ;;  %vm362_vm0 = vsmask.f32 7424 }
  0x35   : > { %v1635_v1 = vld [vmem:[#allocation5 + $0x78] sm:$0xff]  ;;  %1673 = vmatpush.bf16.msra.mxu2 %v1627_v0  ;;  %v1634_v3 = vld [vmem:[#allocation5 + $0x70] sm:$0xff]  ;;  %624 = vmatpush.bf16.msra.mxu0 %v1627_v0  ;;  %v1625_v4 = vld [vmem:[#allocation5 + $0x28] sm:$0xff]  ;;  %vm404_vm1 = vcmask 1047552   ;;  %vm407_vm3 = vcmask 1046528   ;;  %s1406_s17 = sshll.u32 %s2093_s14, 6 }
  0x36   : > { %1681 = vmatpush.bf16.msra.mxu3 %v1635_v1  ;;  %653 = vmatpush.bf16.msra.mxu1 %v1635_v1  ;;  %v1633_v5 = vld [vmem:[#allocation5 + $0x68] sm:$0xff]  ;;  %v1624_v6 = vld [vmem:[#allocation5 + $0x20] sm:$0xff]  ;;  %v1623_v8 = vld [vmem:[#allocation5 + $0x18] sm:$0xff]  ;;  %s2245_s11 = scalar_lea.vmem [#allocation8], %s1406_s17  ;;  %s1668_s20 = sshll.u32 %s2009_s28, 6 }
  0x37   : > { %v1632_v7 = vld [vmem:[#allocation5 + $0x60] sm:$0xff]  ;;  %v1631_v9 = vld [vmem:[#allocation5 + $0x58] sm:$0xff]  ;;  %v2108_v10 = vld [vmem:[%s2097_s13 + $0x10] sm:$0xff]  ;;  %s1299_s30 = sshll.u32 %s2245_s11, 4  ;;  %s1287_s18 = scalar_lea.sflag [#allocation4], %s2093_s14  ;;  %s1300_s30 = int_to_ptr.vmem [resolvable:$true] %s1299_s30 }
  0x38   : > { %v1622_v11 = vld [vmem:[#allocation5 + $0x10] sm:$0xff]  ;;  %v2111_v13 = vld [vmem:[%s2097_s13 + $0x18] sm:$0xff]  ;;  %v379_v14 = vshll.u32 %v2108_v10, 16  ;;  %v1621_v15 = vld [vmem:[#allocation5 + $0x8] sm:$0xff]  ;;  %v383_v19 = vshrl.u32 %v2108_v10, 16  ;;  %v411_v59 = vrot.slane %v2108_v10, 1 }
  0x39   : > { %1674 = vmatpush.bf16.msra.mxu2 %v1626_v2  ;;  %625 = vmatpush.bf16.msra.mxu0 %v1626_v2  ;;  %v1630_v12 = vld [vmem:[#allocation5 + $0x50] sm:$0xff]  ;;  %v2115_v16 = vld [vmem:[%s2097_s13] sm:$0xff]   ;;  %v1629_v17 = vld [vmem:[#allocation5 + $0x48] sm:$0xff]  ;;  %v387_v20 = vshll.u32 %v2111_v13, 16  ;;  %v391_v39 = vshrl.u32 %v2111_v13, 16  ;;  %v413_v56 = vrot.slane %v2111_v13, 1 }
  0x3a   : > { %1682 = vmatpush.bf16.msra.mxu3 %v1634_v3  ;;  %654 = vmatpush.bf16.msra.mxu1 %v1634_v3  ;;  %v381_v18 = vrot.slane %v379_v14, 1  ;;  %v2120_v21 = vld [vmem:[%s2097_s13 + $0x8] sm:$0xff]  ;;  %v366_v22 = vshll.u32 %v2115_v16, 16  ;;  %v364_v23 = vshrl.u32 %v2115_v16, 16  ;;  %v1620_v26 = vld [vmem:[#allocation5] sm:$0xff]  ;;  %v1643_v30 = vld [vmem:[#allocation5 + $0xb8] sm:$0xff]  ;;  %v1671_v34 = vunpack.c.l.b16 %v2115_v16  ;;  %s1298_s13 = scalar_lea.hbm %s2296_s7, %s1668_s20 }
  0x3b   : > { %v371_v25 = vshll.u32 %v2120_v21, 16  ;;  %v1628_v27 = vld [vmem:[#allocation5 + $0x40] sm:$0xff]  ;;  %v389_v29 = vrot.slane %v387_v20, 1  ;;  %v1642_v35 = vld [vmem:[#allocation5 + $0xb0] sm:$0xff]  ;;  %v1641_v38 = vld [vmem:[#allocation5 + $0xa8] sm:$0xff]  ;;  %v375_v42 = vshrl.u32 %v2120_v21, 16  ;;  %v414_v61 = vsel %vm407_vm3, %v411_v59, %v413_v56 }
  0x3c   : > { %v368_v24 = vrot.slane %v366_v22, 1  ;;  %v385_v28 = vor.u32 %v383_v19, %v381_v18  ;;  %v398_v37 = vpack.c.b16 %v1671_v34, %v1671_v34  ;;  %v1640_v41 = vld [vmem:[#allocation5 + $0xa0] sm:$0xff]  ;;  %v1639_v45 = vld [vmem:[#allocation5 + $0x98] sm:$0xff]  ;;  %vm2133_vm2 = vmand %vm404_vm1, %vm362_vm0  ;;  %v408_v53 = vrot.slane %v2115_v16, 1  ;;  %s1301_s12 = sshll.u32 %s1298_s13, 4  ;;  %s1890_s15 = scalar_lea.hbm %s2296_s7, 128  ;;  %s1302_s12 = int_to_ptr.hbm [resolvable:$true] %s1301_s12 }
  0x3d   : > { %1675 = vmatpush.bf16.msra.mxu2 %v1625_v4  ;;  %626 = vmatpush.bf16.msra.mxu0 %v1625_v4  ;;  %v373_v32 = vrot.slane %v371_v25, 1  ;;  %v393_v43 = vor.u32 %v391_v39, %v389_v29  ;;  %v1638_v49 = vld [vmem:[#allocation5 + $0x90] sm:$0xff]  ;;  %v1637_v51 = vld [vmem:[#allocation5 + $0x88] sm:$0xff]  ;;  %v1636_v52 = vld [vmem:[#allocation5 + $0x80] sm:$0xff]  ;;  %v409_v54 = vrot.slane %v2120_v21, 1  ;;  %s1884_s28 = sshra.s32 %s1302_s12, 4  ;;  %s1885_s28 = int_to_ptr.hbm [resolvable:$true] %s1884_s28 }
  0x3e   : > { %1683 = vmatpush.bf16.msra.mxu3 %v1633_v5  ;;  %655 = vmatpush.bf16.msra.mxu1 %v1633_v5  ;;  %v369_v31 = vor.u32 %v368_v24, %v364_v23  ;;  %v390_v33 = vsel %vm362_vm0, %v385_v28, %v389_v29  ;;  %v400_v40 = vshll.u32 %v398_v37, 16  ;;  %v418_v57 = vrot.slane %v398_v37, 1  ;;  %v1760_v3 = vld [vmem:[%s2291_s2] ss:$0 sm:$0xff]  ;;  %s1886_s21 = scalar_lea.hbm %s1885_s28, 64  ;;  %p1891_p11 = scmp.lt.s32.totalorder %s1885_s28, %s2296_s7 }
  0x3f   : > { %v377_v47 = vor.u32 %v375_v42, %v373_v32  ;;  %v410_v55 = vsel %vm407_vm3, %v408_v53, %v409_v54  ;;  %v412_v60 = vsel %vm407_vm3, %v409_v54, %v411_v59  ;;  %p1887_p1 = scmp.ne.s32.totalorder %s1885_s28, %s1886_s21  ;;  %p1892_p2 = scmp.lt.s32.totalorder %s1890_s15, %s1886_s21 }
  0x40   : > { %v374_v36 = vsel %vm362_vm0, %v369_v31, %v373_v32  ;;  %v402_v44 = vrot.slane %v400_v40, 1  ;;  %v422_v58 = vsel %vm407_vm3, %v413_v56, %v418_v57 }
  0x41   : > { %1676 = vmatpush.bf16.msra.mxu2 %v1624_v6  ;;  %627 = vmatpush.bf16.msra.mxu0 %v1624_v6  ;;  %v382_v50 = vsel %vm362_vm0, %v377_v47, %v381_v18  ;;  %p1888_p4 = pnand %p1887_p1, %p2060_p3  ;;  %p1893_p9 = por %p1892_p2, %p1891_p11 }
  0x42   : > { %1684 = vmatpush.bf16.msra.mxu3 %v1632_v7  ;;  %656 = vmatpush.bf16.msra.mxu1 %v1632_v7  ;;  %v406_v48 = vsel %vm2133_vm2, %v393_v43, %v402_v44 }
  0x43   : > { %p1889_p8 = pneg %p1888_p4 }
  0x45   : > { %1677 = vmatpush.bf16.msra.mxu2 %v1623_v8  ;;  %628 = vmatpush.bf16.msra.mxu0 %v1623_v8  ;;  %p1894_p10 = pnand %p1893_p9, %p1889_p8 }
  0x46   : > { %1685 = vmatpush.bf16.msra.mxu3 %v1631_v9  ;;  %657 = vmatpush.bf16.msra.mxu1 %v1631_v9 }
  0x49   : > { %1678 = vmatpush.bf16.msra.mxu2 %v1622_v11  ;;  %629 = vmatpush.bf16.msra.mxu0 %v1622_v11 }
  0x4a   : > { %1686 = vmatpush.bf16.msra.mxu3 %v1630_v12  ;;  %658 = vmatpush.bf16.msra.mxu1 %v1630_v12 }
  0x4d   : > { %1679 = vmatpush.bf16.msra.mxu2 %v1621_v15  ;;  %630 = vmatpush.bf16.msra.mxu0 %v1621_v15 }
  0x4e   : > { %1687 = vmatpush.bf16.msra.mxu3 %v1629_v17  ;;  %659 = vmatpush.bf16.msra.mxu1 %v1629_v17 }
  0x51   : > { %1680 = vmatpush.bf16.msra.mxu2 %v1620_v26  ;;  %631 = vmatpush.bf16.msra.mxu0 %v1620_v26 }
  0x52   : > { %1688 = vmatpush.bf16.msra.mxu3 %v1628_v27  ;;  %660 = vmatpush.bf16.msra.mxu1 %v1628_v27 }
  0x54   : > { %642 = vmatmul.bf16.vlgmr.msra.gmra.mxu2 %v2108_v10  ;;  %632 = vmatmul.bf16.vlgmr.msra.gmra.mxu0 %v2115_v16 }
  0x55   : > { %682 = vmatpush.bf16.msrb.mxu2 %v1643_v30  ;;  %671 = vmatmul.bf16.vlgmr.msra.gmra.mxu3 %v390_v33 }
  0x56   : > { %661 = vmatmul.bf16.vlgmr.msra.gmra.mxu1 %v374_v36 }
  0x59   : > { %683 = vmatpush.bf16.msrb.mxu2 %v1642_v35 }
  0x5d   : > { %684 = vmatpush.bf16.msrb.mxu2 %v1641_v38 }
  0x61   : > { %685 = vmatpush.bf16.msrb.mxu2 %v1640_v41 }
  0x64   : > { %647 = vmatmul.bf16.gmra.mxu2 %v2111_v13  ;;  %637 = vmatmul.bf16.gmra.mxu0 %v2120_v21 }
  0x65   : > { %686 = vmatpush.bf16.msrb.mxu2 %v1639_v45  ;;  %676 = vmatmul.bf16.gmra.mxu3 %v406_v48  ;;  %v735_v48 = vlaneseq }
  0x66   : > { %666 = vmatmul.bf16.gmra.mxu1 %v382_v50 }
  0x69   : > { %687 = vmatpush.bf16.msrb.mxu2 %v1638_v49  ;;  %v736_v49 = vand.u32 127, %v735_v48 }
  0x6b   : > { %vm737_vm4 = vcmp.lt.s32.totalorder %v736_v49, 112  ;;  %v1656_v49 = vld [vmem:[#allocation7 + $0x60] sm:$0xff] }
  0x6d   : > { %688 = vmatpush.bf16.msrb.mxu2 %v1637_v51 }
  0x71   : > { %689 = vmatpush.bf16.msrb.mxu2 %v1636_v52 }
  0x74   : > { %690 = vmatmul.bf16.vlgmr.msrb.gmra.mxu2 %v410_v55 }
  0x84   : > { %695 = vmatmul.bf16.gmra.mxu2 %v412_v60 }
  0x94   : > { %700 = vmatmul.bf16.gmra.mxu2 %v414_v61 }
  0xa4   : > { %705 = vmatmul.bf16.gmra.mxu2 %v422_v58 }
  0xd1   : > { %v633_v1 = vpop.f32.mrf.mxu0 }
  0xd2   : > { %v634_v5 = vadd.f32 %v1760_v3, %v633_v1 }
  0xd3   : > { %v662_v2 = vpop.f32.mrf.mxu1 }
  0xd4   : > { %v663_v7 = vadd.f32 %v662_v2, %v634_v5 }
  0xd7   : > { %v643_v62 = vpop.f32.mrf.mxu2 }
  0xd8   : > { %v672_v24 = vpop.f32.mrf.mxu3  ;;  %v644_v28 = vadd.f32 %v1760_v3, %v643_v62 }
  0xd9   : > { %v635_v6 = vpop.f32.mrf.mxu0 }
  0xda   : > { %v636_v11 = vadd.f32 %v1760_v3, %v635_v6  ;;  %v673_v29 = vadd.f32 %v672_v24, %v644_v28  ;;  %v1649_v28 = vld [vmem:[#allocation7 + $0x28] sm:$0xff] }
  0xdb   : > { %v664_v8 = vpop.f32.mrf.mxu1 }
  0xdc   : > { %v665_v13 = vadd.f32 %v664_v8, %v636_v11 }
  0xdf   : > { %v645_v63 = vpop.f32.mrf.mxu2 }
  0xe0   : > { %v674_v30 = vpop.f32.mrf.mxu3  ;;  %v646_v33 = vadd.f32 %v1760_v3, %v645_v63 }
  0xe1   : > { %v638_v12 = vpop.f32.mrf.mxu0 }
  0xe2   : > { %v639_v15 = vadd.f32 %v1760_v3, %v638_v12  ;;  %v675_v34 = vadd.f32 %v674_v30, %v646_v33  ;;  %v1647_v30 = vld [vmem:[#allocation7 + $0x18] sm:$0xff] }
  0xe3   : > { %v667_v17 = vpop.f32.mrf.mxu1  ;;  %v1659_v33 = vld [vmem:[#allocation7 + $0x78] sm:$0xff] }
  0xe4   : > { %v668_v18 = vadd.f32 %v667_v17, %v639_v15  ;;  %1220 = vmatpush.bf16.msrb.mxu0 %v1659_v33 }
  0xe7   : > { %v648_v0 = vpop.f32.mrf.mxu2 }
  0xe8   : > { %v677_v37 = vpop.f32.mrf.mxu3  ;;  %v649_v38 = vadd.f32 %v1760_v3, %v648_v0 }
  0xe9   : > { %v640_v19 = vpop.f32.mrf.mxu0 }
  0xea   : > { %v641_v22 = vadd.f32 %v1760_v3, %v640_v19  ;;  %v678_v39 = vadd.f32 %v677_v37, %v649_v38  ;;  %v1645_v37 = vld [vmem:[#allocation7 + $0x8] sm:$0xff] }
  0xeb   : > { %v669_v23 = vpop.f32.mrf.mxu1 }
  0xec   : > { %v670_v25 = vadd.f32 %v669_v23, %v641_v22 }
  0xef   : > { %v650_v4 = vpop.f32.mrf.mxu2 }
  0xf0   : > { %v651_v42 = vadd.f32 %v1760_v3, %v650_v4  ;;  %v679_v43 = vpop.f32.mrf.mxu3 }
  0xf2   : > { %v680_v44 = vadd.f32 %v679_v43, %v651_v42  ;;  %v1657_v42 = vld [vmem:[#allocation7 + $0x68] sm:$0xff] }
  0xf7   : > { %v691_v9 = vpop.f32.mrf.mxu2 }
  0xf8   : > { %v692_v10 = vadd.f32 %v691_v9, %v663_v7 }
  0xfa   : > { %711 = vadd.xlane.f32.xlu0 %v692_v10 }
  0xff   : > { %v693_v14 = vpop.f32.mrf.mxu2 }
 0x100   : > { %v694_v16 = vadd.f32 %v693_v14, %v665_v13 }
 0x102   : > { %713 = vadd.xlane.f32.xlu0 %v694_v16 }
 0x107   : > { %v696_v20 = vpop.f32.mrf.mxu2 }
 0x108   : > { %v697_v21 = vadd.f32 %v696_v20, %v668_v18 }
 0x10a   : > { %715 = vadd.xlane.f32.xlu1 %v697_v21 }
 0x10f   : > { %v698_v26 = vpop.f32.mrf.mxu2 }
 0x110   : > { %v699_v27 = vadd.f32 %v698_v26, %v670_v25  ;;  %v1651_v26 = vld [vmem:[#allocation7 + $0x38] sm:$0xff] }
 0x111   : > { %1191 = vmatpush.bf16.msrb.mxu3 %v1651_v26 }
 0x112   : > { %717 = vadd.xlane.f32.xlu1 %v699_v27 }
 0x117   : > { %v701_v31 = vpop.f32.mrf.mxu2 }
 0x118   : > { %v702_v32 = vadd.f32 %v701_v31, %v673_v29  ;;  %v1648_v29 = vld [vmem:[#allocation7 + $0x20] sm:$0xff]  ;;  %v1667_v31 = vld [vmem:[#allocation7 + $0xb8] sm:$0xff] }
 0x119   : > { %1249 = vmatpush.bf16.msrb.mxu1 %v1667_v31 }
 0x11a   : > { %719 = vadd.xlane.f32.xlu2 %v702_v32 }
 0x11f   : > { %v703_v35 = vpop.f32.mrf.mxu2 }
 0x120   : > { %v704_v36 = vadd.f32 %v703_v35, %v675_v34 }
 0x122   : > { %721 = vadd.xlane.f32.xlu2 %v704_v36 }
 0x127   : > { %v706_v40 = vpop.f32.mrf.mxu2 }
 0x128   : > { %v707_v41 = vadd.f32 %v706_v40, %v678_v39  ;;  %v1658_v39 = vld [vmem:[#allocation7 + $0x70] sm:$0xff]  ;;  %v1665_v40 = vld [vmem:[#allocation7 + $0xa8] sm:$0xff] }
 0x129   : > { %1221 = vmatpush.bf16.msrb.mxu0 %v1658_v39 }
 0x12a   : > { %723 = vadd.xlane.f32.xlu0 %v707_v41 }
 0x12d   : > { %1222 = vmatpush.bf16.msrb.mxu0 %v1657_v42 }
 0x12f   : > { %v708_v45 = vpop.f32.mrf.mxu2 }
 0x130   : > { %v709_v47 = vadd.f32 %v708_v45, %v680_v44  ;;  %v1664_v45 = vld [vmem:[#allocation7 + $0xa0] sm:$0xff] }
 0x131   : > { %1223 = vmatpush.bf16.msrb.mxu0 %v1656_v49 }
 0x132   : > { %725 = vadd.xlane.f32.xlu1 %v709_v47 }
 0x16d   : > { %v712_v50 = vpop.xlane.xlu0 %711 }
 0x16e   : > { %v727_v51 = vmul.f32 0.008928572, %v712_v50 }
 0x170   : > { %v738_v52 = vsub.f32 %v692_v10, %v727_v51  ;;  %v1663_v51 = vld [vmem:[#allocation7 + $0x98] sm:$0xff] }
 0x172   : > { %v2154_v53 = vsel %vm737_vm4, %v738_v52, 0.0 }
 0x173   : > { %v754_v54 = vmul.f32 %v2154_v53, %v2154_v53 }
 0x175   : > { %762 = vadd.xlane.f32.xlu2 %v754_v54  ;;  %v714_v55 = vpop.xlane.xlu0 %713  ;;  %v1655_v54 = vld [vmem:[#allocation7 + $0x58] sm:$0xff] }
 0x176   : > { %v728_v56 = vmul.f32 0.008928572, %v714_v55  ;;  %1224 = vmatpush.bf16.msrb.mxu0 %v1655_v54 }
 0x178   : > { %v739_v57 = vsub.f32 %v694_v16, %v728_v56 }
 0x17a   : > { %v2159_v58 = vsel %vm737_vm4, %v739_v57, 0.0 }
 0x17b   : > { %v755_v59 = vmul.f32 %v2159_v58, %v2159_v58 }
 0x17d   : > { %v716_v60 = vpop.xlane.xlu1 %715  ;;  %764 = vadd.xlane.f32.xlu0 %v755_v59  ;;  %v1662_v59 = vld [vmem:[#allocation7 + $0x90] sm:$0xff] }
 0x17e   : > { %v729_v61 = vmul.f32 0.008928572, %v716_v60 }
 0x180   : > { %v740_v62 = vsub.f32 %v697_v21, %v729_v61 }
 0x182   : > { %v2164_v63 = vsel %vm737_vm4, %v740_v62, 0.0 }
 0x183   : > { %v756_v0 = vmul.f32 %v2164_v63, %v2164_v63 }
 0x185   : > { %v718_v1 = vpop.xlane.xlu1 %717  ;;  %766 = vadd.xlane.f32.xlu1 %v756_v0  ;;  %v1654_v0 = vld [vmem:[#allocation7 + $0x50] sm:$0xff] }
 0x186   : > { %v730_v2 = vmul.f32 0.008928572, %v718_v1  ;;  %1225 = vmatpush.bf16.msrb.mxu0 %v1654_v0 }
 0x188   : > { %v741_v3 = vsub.f32 %v699_v27, %v730_v2  ;;  %v1650_v27 = vld [vmem:[#allocation7 + $0x30] sm:$0xff] }
 0x189   : > { %1192 = vmatpush.bf16.msrb.mxu3 %v1650_v27 }
 0x18a   : > { %v2169_v4 = vsel %vm737_vm4, %v741_v3, 0.0  ;;  %v1661_v3 = vld [vmem:[#allocation7 + $0x88] sm:$0xff] }
 0x18b   : > { %v757_v5 = vmul.f32 %v2169_v4, %v2169_v4 }
 0x18d   : > { %v720_v6 = vpop.xlane.xlu2 %719  ;;  %768 = vadd.xlane.f32.xlu2 %v757_v5  ;;  %1193 = vmatpush.bf16.msrb.mxu3 %v1649_v28 }
 0x18e   : > { %v731_v7 = vmul.f32 0.008928572, %v720_v6 }
 0x190   : > { %v742_v8 = vsub.f32 %v702_v32, %v731_v7  ;;  %v1646_v32 = vld [vmem:[#allocation7 + $0x10] sm:$0xff]  ;;  %v2196_v7 = vld [vmem:[%s2292_s3] ss:$0 sm:$0xff] }
 0x191   : > { %1194 = vmatpush.bf16.msrb.mxu3 %v1648_v29 }
 0x192   : > { %v2174_v9 = vsel %vm737_vm4, %v742_v8, 0.0 }
 0x193   : > { %v758_v10 = vmul.f32 %v2174_v9, %v2174_v9 }
 0x195   : > { %v722_v11 = vpop.xlane.xlu2 %721  ;;  %770 = vadd.xlane.f32.xlu0 %v758_v10  ;;  %1195 = vmatpush.bf16.msrb.mxu3 %v1647_v30  ;;  %v1653_v10 = vld [vmem:[#allocation7 + $0x48] sm:$0xff] }
 0x196   : > { %v732_v12 = vmul.f32 0.008928572, %v722_v11  ;;  %1226 = vmatpush.bf16.msrb.mxu0 %v1653_v10 }
 0x198   : > { %v743_v13 = vsub.f32 %v704_v36, %v732_v12  ;;  %v1666_v36 = vld [vmem:[#allocation7 + $0xb0] sm:$0xff] }
 0x199   : > { %1196 = vmatpush.bf16.msrb.mxu3 %v1646_v32  ;;  %1250 = vmatpush.bf16.msrb.mxu1 %v1666_v36 }
 0x19a   : > { %v2179_v14 = vsel %vm737_vm4, %v743_v13, 0.0 }
 0x19b   : > { %v759_v15 = vmul.f32 %v2179_v14, %v2179_v14 }
 0x19d   : > { %772 = vadd.xlane.f32.xlu1 %v759_v15  ;;  %v724_v16 = vpop.xlane.xlu0 %723  ;;  %1197 = vmatpush.bf16.msrb.mxu3 %v1645_v37  ;;  %v1660_v15 = vld [vmem:[#allocation7 + $0x80] sm:$0xff] }
 0x19e   : > { %v733_v17 = vmul.f32 0.008928572, %v724_v16  ;;  %1251 = vmatpush.bf16.msrb.mxu1 %v1665_v40 }
 0x1a0   : > { %v744_v18 = vsub.f32 %v707_v41, %v733_v17  ;;  %v1644_v41 = vld [vmem:[#allocation7] sm:$0xff] }
 0x1a1   : > { %1198 = vmatpush.bf16.msrb.mxu3 %v1644_v41 }
 0x1a2   : > { %v2184_v19 = vsel %vm737_vm4, %v744_v18, 0.0  ;;  %1252 = vmatpush.bf16.msrb.mxu1 %v1664_v45 }
 0x1a3   : > { %v760_v20 = vmul.f32 %v2184_v19, %v2184_v19 }
 0x1a5   : > { %v726_v21 = vpop.xlane.xlu1 %725  ;;  %774 = vadd.xlane.f32.xlu2 %v760_v20 }
 0x1a6   : > { %v734_v22 = vmul.f32 0.008928572, %v726_v21  ;;  %1253 = vmatpush.bf16.msrb.mxu1 %v1663_v51  ;;  %v2203_v21 = vld [vmem:[%s2293_s4] ss:$0 sm:$0xff] }
 0x1a8   : > { %v745_v23 = vsub.f32 %v709_v47, %v734_v22 }
 0x1aa   : > { %v2189_v24 = vsel %vm737_vm4, %v745_v23, 0.0  ;;  %1254 = vmatpush.bf16.msrb.mxu1 %v1662_v59 }
 0x1ab   : > { %v761_v25 = vmul.f32 %v2189_v24, %v2189_v24 }
 0x1ad   : > { %776 = vadd.xlane.f32.xlu0 %v761_v25 }
 0x1ae   : > { %1255 = vmatpush.bf16.msrb.mxu1 %v1661_v3 }
 0x1b2   : > { %1256 = vmatpush.bf16.msrb.mxu1 %v1660_v15 }
 0x1e8   : > { %v763_v34 = vpop.xlane.xlu2 %762 }
 0x1e9   : > { %v778_v35 = vmul.f32 0.008928572, %v763_v34 }
 0x1eb   : > { %v786_v38 = vadd.f32 1e-05, %v778_v35 }
 0x1ed   : > { %1764 = vrsqrt.f32 %v786_v38  ;;  %vm800_vm6 = vweird.f32 %v786_v38 }
 0x1f0   : > { %v765_v43 = vpop.xlane.xlu0 %764 }
 0x1f1   : > { %v779_v44 = vmul.f32 0.008928572, %v765_v43 }
 0x1f3   : > { %v1765_v47 = vpop.eup %1764  ;;  %v787_v48 = vadd.f32 1e-05, %v779_v44 }
 0x1f4   : > { %v795_v50 = vmul.f32 %v1765_v47, %v786_v38  ;;  %vm801_vm5 = vweird.f32 %v1765_v47 }
 0x1f5   : > { %1766 = vrsqrt.f32 %v787_v48  ;;  %vm802_vm7 = vmor %vm800_vm6, %vm801_vm5  ;;  %vm810_vm9 = vweird.f32 %v787_v48 }
 0x1f6   : > { %v796_v52 = vmul.f32 %v1765_v47, %v795_v50 }
 0x1f8   : > { %v797_v55 = vmul.f32 0.5, %v796_v52  ;;  %v767_v56 = vpop.xlane.xlu1 %766 }
 0x1f9   : > { %v780_v57 = vmul.f32 0.008928572, %v767_v56 }
 0x1fa   : > { %v798_v60 = vsub.f32 1.5, %v797_v55 }
 0x1fb   : > { %v1767_v61 = vpop.eup %1766  ;;  %v788_v62 = vadd.f32 1e-05, %v780_v57 }
 0x1fc   : > { %v799_v1 = vmul.f32 %v1765_v47, %v798_v60  ;;  %v805_v2 = vmul.f32 %v1767_v61, %v787_v48  ;;  %vm811_vm8 = vweird.f32 %v1767_v61 }
 0x1fd   : > { %1768 = vrsqrt.f32 %v788_v62  ;;  %vm812_vm10 = vmor %vm810_vm9, %vm811_vm8  ;;  %vm820_vm12 = vweird.f32 %v788_v62 }
 0x1fe   : > { %v803_v5 = vsel %vm802_vm7, %v1765_v47, %v799_v1  ;;  %v806_v6 = vmul.f32 %v1767_v61, %v805_v2 }
 0x1ff   : > { %v874_v8 = vmul.f32 %v803_v5, %v2154_v53  ;;  %v1652_v53 = vld [vmem:[#allocation7 + $0x40] sm:$0xff] }
 0x200   : > { %v807_v11 = vmul.f32 0.5, %v806_v6  ;;  %v769_v12 = vpop.xlane.xlu2 %768  ;;  %1227 = vmatpush.bf16.msrb.mxu0 %v1652_v53 }
 0x201   : > { %v781_v13 = vmul.f32 0.008928572, %v769_v12  ;;  %v886_v18 = vmul.f32 %v2196_v7, %v874_v8 }
 0x202   : > { %v808_v16 = vsub.f32 1.5, %v807_v11 }
 0x203   : > { %v1769_v17 = vpop.eup %1768  ;;  %v789_v20 = vadd.f32 1e-05, %v781_v13  ;;  %v898_v28 = vadd.f32 %v2203_v21, %v886_v18 }
 0x204   : > { %v809_v22 = vmul.f32 %v1767_v61, %v808_v16  ;;  %v815_v23 = vmul.f32 %v1769_v17, %v788_v62  ;;  %vm821_vm11 = vweird.f32 %v1769_v17 }
 0x205   : > { %1770 = vrsqrt.f32 %v789_v20  ;;  %v906_v37 = vpack.c.bf16 %v898_v28, %v898_v28  ;;  %vm822_vm13 = vmor %vm820_vm12, %vm821_vm11  ;;  %vm830_vm15 = vweird.f32 %v789_v20 }
 0x206   : > { %v813_v25 = vsel %vm812_vm10, %v1767_v61, %v809_v22  ;;  %v816_v26 = vmul.f32 %v1769_v17, %v815_v23 }
 0x207   : > { %v875_v27 = vmul.f32 %v813_v25, %v2159_v58  ;;  %v2210_v43 = vunpack.c.l.b16 %v906_v37 }
 0x208   : > { %v817_v29 = vmul.f32 0.5, %v816_v26  ;;  %v771_v30 = vpop.xlane.xlu0 %770 }
 0x209   : > { %v887_v31 = vmul.f32 %v2196_v7, %v875_v27  ;;  %v782_v32 = vmul.f32 0.008928572, %v771_v30 }
 0x20a   : > { %v818_v33 = vsub.f32 1.5, %v817_v29 }
 0x20b   : > { %v1771_v34 = vpop.eup %1770  ;;  %v790_v35 = vadd.f32 1e-05, %v782_v32  ;;  %v899_v36 = vadd.f32 %v2203_v21, %v887_v31 }
 0x20c   : > { %v819_v38 = vmul.f32 %v1769_v17, %v818_v33  ;;  %v825_v39 = vmul.f32 %v1771_v34, %v789_v20  ;;  %vm831_vm14 = vweird.f32 %v1771_v34 }
 0x20d   : > { %1772 = vrsqrt.f32 %v790_v35  ;;  %v907_v58 = vpack.c.bf16 %v899_v36, %v899_v36  ;;  %vm832_vm1 = vmor %vm830_vm15, %vm831_vm14  ;;  %vm840_vm5 = vweird.f32 %v790_v35 }
 0x20e   : > { %v823_v40 = vsel %vm822_vm13, %v1769_v17, %v819_v38  ;;  %v826_v41 = vmul.f32 %v1771_v34, %v825_v39 }
 0x20f   : > { %v876_v42 = vmul.f32 %v823_v40, %v2164_v63  ;;  %v923_v44 = vunpack.c.l.b16 %v907_v58 }
 0x210   : > { %v827_v45 = vmul.f32 0.5, %v826_v41  ;;  %v773_v47 = vpop.xlane.xlu1 %772 }
 0x211   : > { %v783_v48 = vmul.f32 0.008928572, %v773_v47  ;;  %v930_v49 = vpack.c.b16 %v923_v44, %v2210_v43  ;;  %v888_v52 = vmul.f32 %v2196_v7, %v876_v42 }
 0x212   : > { %v828_v50 = vsub.f32 1.5, %v827_v45 }
 0x213   : > { %v1773_v51 = vpop.eup %1772  ;;  %v791_v54 = vadd.f32 1e-05, %v783_v48  ;;  %1199 = vmatmul.bf16.vlgmr.msrb.gmra.mxu3 %v930_v49  ;;  %v900_v60 = vadd.f32 %v2203_v21, %v888_v52  ;;  %v937_v12 = vshll.u32 %v930_v49, 16  ;;  %v976_v27 = vrot.slane %v930_v49, 1 }
 0x214   : > { %v829_v55 = vmul.f32 %v1771_v34, %v828_v50  ;;  %v835_v56 = vmul.f32 %v1773_v51, %v790_v35  ;;  %vm841_vm4 = vweird.f32 %v1773_v51  ;;  %v935_v28 = vshrl.u32 %v930_v49, 16 }
 0x215   : > { %1774 = vrsqrt.f32 %v791_v54  ;;  %v908_v8 = vpack.c.bf16 %v900_v60, %v900_v60  ;;  %vm842_vm6 = vmor %vm840_vm5, %vm841_vm4  ;;  %v939_v25 = vrot.slane %v937_v12, 1  ;;  %vm850_vm8 = vweird.f32 %v791_v54 }
 0x216   : > { %v833_v63 = vsel %vm832_vm1, %v1771_v34, %v829_v55  ;;  %v836_v57 = vmul.f32 %v1773_v51, %v835_v56 }
 0x217   : > { %v877_v59 = vmul.f32 %v833_v63, %v2169_v4  ;;  %v924_v17 = vunpack.c.l.b16 %v908_v8  ;;  %v940_v36 = vor.u32 %v939_v25, %v935_v28 }
 0x218   : > { %v837_v61 = vmul.f32 0.5, %v836_v57  ;;  %v775_v62 = vpop.xlane.xlu2 %774 }
 0x219   : > { %v889_v0 = vmul.f32 %v2196_v7, %v877_v59  ;;  %v784_v1 = vmul.f32 0.008928572, %v775_v62 }
 0x21a   : > { %v838_v2 = vsub.f32 1.5, %v837_v61 }
 0x21b   : > { %v1775_v3 = vpop.eup %1774  ;;  %v792_v5 = vadd.f32 1e-05, %v784_v1  ;;  %v901_v6 = vadd.f32 %v2203_v21, %v889_v0 }
 0x21c   : > { %v839_v10 = vmul.f32 %v1773_v51, %v838_v2  ;;  %v845_v11 = vmul.f32 %v1775_v3, %v791_v54  ;;  %vm851_vm7 = vweird.f32 %v1775_v3 }
 0x21d   : > { %1776 = vrsqrt.f32 %v792_v5  ;;  %v909_v4 = vpack.c.bf16 %v901_v6, %v901_v6  ;;  %vm852_vm9 = vmor %vm850_vm8, %vm851_vm7  ;;  %vm860_vm11 = vweird.f32 %v792_v5 }
 0x21e   : > { %v843_v13 = vsel %vm842_vm6, %v1773_v51, %v839_v10  ;;  %v846_v15 = vmul.f32 %v1775_v3, %v845_v11 }
 0x21f   : > { %v878_v16 = vmul.f32 %v843_v13, %v2174_v9  ;;  %v925_v18 = vunpack.c.l.b16 %v909_v4 }
 0x220   : > { %v847_v20 = vmul.f32 0.5, %v846_v15  ;;  %v777_v53 = vpop.xlane.xlu0 %776 }
 0x221   : > { %v785_v22 = vmul.f32 0.008928572, %v777_v53  ;;  %v931_v23 = vpack.c.b16 %v925_v18, %v924_v17  ;;  %v890_v30 = vmul.f32 %v2196_v7, %v878_v16 }
 0x222   : > { %v848_v26 = vsub.f32 1.5, %v847_v20 }
 0x223   : > { %v1777_v29 = vpop.eup %1776  ;;  %v793_v31 = vadd.f32 1e-05, %v785_v22  ;;  %1204 = vmatmul.bf16.gmra.mxu3 %v931_v23  ;;  %v977_v32 = vrot.slane %v931_v23, 1  ;;  %v942_v33 = vshll.u32 %v931_v23, 16  ;;  %v902_v41 = vadd.f32 %v2203_v21, %v890_v30 }
 0x224   : > { %v849_v34 = vmul.f32 %v1775_v3, %v848_v26  ;;  %v855_v9 = vmul.f32 %v1777_v29, %v792_v5  ;;  %vm861_vm10 = vweird.f32 %v1777_v29  ;;  %v946_v0 = vshrl.u32 %v931_v23, 16 }
 0x225   : > { %1778 = vrsqrt.f32 %v793_v31  ;;  %v978_v35 = vsel %vm407_vm3, %v976_v27, %v977_v32  ;;  %v944_v37 = vrot.slane %v942_v33, 1  ;;  %v910_v49 = vpack.c.bf16 %v902_v41, %v902_v41  ;;  %vm862_vm12 = vmor %vm860_vm11, %vm861_vm10 }
 0x226   : > { %v853_v38 = vsel %vm852_vm9, %v1775_v3, %v849_v34  ;;  %v856_v39 = vmul.f32 %v1777_v29, %v855_v9  ;;  %1257 = vmatmul.bf16.vlgmr.msrb.gmra.mxu1 %v978_v35  ;;  %vm870_vm14 = vweird.f32 %v793_v31  ;;  %v1763_v9 = vld [vmem:[%s2295_s6] ss:$0 sm:$0xff] }
 0x227   : > { %v879_v58 = vmul.f32 %v853_v38, %v2179_v14  ;;  %v945_v40 = vsel %vm362_vm0, %v940_v36, %v944_v37  ;;  %v926_v56 = vunpack.c.l.b16 %v910_v49  ;;  %v948_v5 = vor.u32 %v946_v0, %v944_v37 }
 0x228   : > { %v857_v42 = vmul.f32 0.5, %v856_v39  ;;  %1228 = vmatmul.bf16.vlgmr.msrb.gmra.mxu0 %v945_v40 }
 0x229   : > { %v891_v44 = vmul.f32 %v2196_v7, %v879_v58 }
 0x22a   : > { %v858_v45 = vsub.f32 1.5, %v857_v42 }
 0x22b   : > { %v1779_v47 = vpop.eup %1778  ;;  %v903_v48 = vadd.f32 %v2203_v21, %v891_v44 }
 0x22c   : > { %v859_v50 = vmul.f32 %v1777_v29, %v858_v45  ;;  %v865_v51 = vmul.f32 %v1779_v47, %v793_v31  ;;  %vm871_vm13 = vweird.f32 %v1779_v47 }
 0x22d   : > { %v911_v52 = vpack.c.bf16 %v903_v48, %v903_v48  ;;  %vm872_vm15 = vmor %vm870_vm14, %vm871_vm13 }
 0x22e   : > { %v863_v14 = vsel %vm862_vm12, %v1777_v29, %v859_v50  ;;  %v866_v54 = vmul.f32 %v1779_v47, %v865_v51 }
 0x22f   : > { %v880_v55 = vmul.f32 %v863_v14, %v2184_v19  ;;  %v927_v63 = vunpack.c.l.b16 %v911_v52 }
 0x230   : > { %v867_v57 = vmul.f32 0.5, %v866_v54 }
 0x231   : > { %v932_v59 = vpack.c.b16 %v927_v63, %v926_v56  ;;  %v892_v61 = vmul.f32 %v2196_v7, %v880_v55 }
 0x232   : > { %v868_v60 = vsub.f32 1.5, %v867_v57 }
 0x233   : > { %1209 = vmatmul.bf16.gmra.mxu3 %v932_v59  ;;  %v979_v62 = vrot.slane %v932_v59, 1  ;;  %v950_v1 = vshll.u32 %v932_v59, 16  ;;  %v904_v11 = vadd.f32 %v2203_v21, %v892_v61  ;;  %v954_v53 = vshrl.u32 %v932_v59, 16 }
 0x234   : > { %v869_v2 = vmul.f32 %v1779_v47, %v868_v60 }
 0x235   : > { %v980_v3 = vsel %vm407_vm3, %v977_v32, %v979_v62  ;;  %v952_v6 = vrot.slane %v950_v1, 1  ;;  %v912_v13 = vpack.c.bf16 %v904_v11, %v904_v11 }
 0x236   : > { %v873_v19 = vsel %vm872_vm15, %v1779_v47, %v869_v2  ;;  %1262 = vmatmul.bf16.gmra.mxu1 %v980_v3 }
 0x237   : > { %v881_v8 = vmul.f32 %v873_v19, %v2189_v24  ;;  %v953_v10 = vsel %vm362_vm0, %v948_v5, %v952_v6  ;;  %v928_v16 = vunpack.c.l.b16 %v912_v13  ;;  %v956_v23 = vor.u32 %v954_v53, %v952_v6 }
 0x238   : > { %1233 = vmatmul.bf16.gmra.mxu0 %v953_v10 }
 0x239   : > { %v893_v4 = vmul.f32 %v2196_v7, %v881_v8  ;;  %v969_v7 = vpack.c.b16 %v2210_v43, %v2210_v43 }
 0x23b   : > { %v905_v12 = vadd.f32 %v2203_v21, %v893_v4  ;;  %v971_v27 = vshll.u32 %v969_v7, 16  ;;  %v986_v28 = vrot.slane %v969_v7, 1 }
 0x23d   : > { %v913_v15 = vpack.c.bf16 %v905_v12, %v905_v12  ;;  %v973_v31 = vrot.slane %v971_v27, 1 }
 0x23f   : > { %v929_v17 = vunpack.c.l.b16 %v913_v15 }
 0x241   : > { %v933_v18 = vpack.c.b16 %v929_v17, %v928_v16 }
 0x243   : > { %1214 = vmatmul.bf16.gmra.mxu3 %v933_v18  ;;  %v981_v20 = vrot.slane %v933_v18, 1  ;;  %v958_v22 = vshll.u32 %v933_v18, 16  ;;  %v962_v21 = vshrl.u32 %v933_v18, 16 }
 0x245   : > { %v982_v24 = vsel %vm407_vm3, %v979_v62, %v981_v20  ;;  %v960_v25 = vrot.slane %v958_v22, 1  ;;  %v989_v30 = vsel %vm407_vm3, %v981_v20, %v986_v28 }
 0x246   : > { %1267 = vmatmul.bf16.gmra.mxu1 %v982_v24 }
 0x247   : > { %v961_v26 = vsel %vm362_vm0, %v956_v23, %v960_v25  ;;  %v964_v29 = vor.u32 %v962_v21, %v960_v25 }
 0x248   : > { %1238 = vmatmul.bf16.gmra.mxu0 %v961_v26 }
 0x249   : > { %v975_v32 = vsel %vm2133_vm2, %v964_v29, %v973_v31 }
 0x256   : > { %1272 = vmatmul.bf16.gmra.mxu1 %v989_v30 }
 0x258   : > { %1243 = vmatmul.bf16.gmra.mxu0 %v975_v32 }
 0x296   : > { %v1200_v33 = vpop.f32.mrf.mxu3 }
 0x297   : > { %v1201_v43 = vadd.f32 %v1763_v9, %v1200_v33 }
 0x29e   : > { %v1202_v34 = vpop.f32.mrf.mxu3 }
 0x29f   : > { %v1203_v58 = vadd.f32 %v1763_v9, %v1202_v34 }
 0x2a3   : > { %v1258_v35 = vpop.f32.mrf.mxu1 }
 0x2a5   : > { %v1229_v36 = vpop.f32.mrf.mxu0 }
 0x2a6   : > { %v1230_v37 = vadd.f32 %v1229_v36, %v1201_v43  ;;  %v1205_v38 = vpop.f32.mrf.mxu3 }
 0x2a7   : > { %v1206_v47 = vadd.f32 %v1763_v9, %v1205_v38 }
 0x2a8   : > { %v1259_v39 = vadd.f32 %v1258_v35, %v1230_v37 }
 0x2aa   : > { %1278 = vst [vmem:[%s2245_s11] sm:$0xff] %v1259_v39 }
 0x2ab   : > { %v1260_v46 = vpop.f32.mrf.mxu1 }
 0x2ad   : > { %v1231_v40 = vpop.f32.mrf.mxu0 }
 0x2ae   : > { %v1232_v41 = vadd.f32 %v1231_v40, %v1203_v58  ;;  %v1207_v44 = vpop.f32.mrf.mxu3 }
 0x2af   : > { %v1208_v14 = vadd.f32 %v1763_v9, %v1207_v44 }
 0x2b0   : > { %v1261_v42 = vadd.f32 %v1260_v46, %v1232_v41 }
 0x2b2   : > { %1279 = vst [vmem:[%s2245_s11 + $0x8] sm:$0xff] %v1261_v42 }
 0x2b3   : > { %v1263_v45 = vpop.f32.mrf.mxu1 }
 0x2b5   : > { %v1234_v48 = vpop.f32.mrf.mxu0 }
 0x2b6   : > { %v1235_v49 = vadd.f32 %v1234_v48, %v1206_v47  ;;  %v1210_v51 = vpop.f32.mrf.mxu3 }
 0x2b7   : > { %v1211_v57 = vadd.f32 %v1763_v9, %v1210_v51 }
 0x2b8   : > { %v1264_v50 = vadd.f32 %v1263_v45, %v1235_v49 }
 0x2ba   : > { %1280 = vst [vmem:[%s2245_s11 + $0x10] sm:$0xff] %v1264_v50 }
 0x2bb   : > { %v1265_v52 = vpop.f32.mrf.mxu1 }
 0x2bd   : > { %v1236_v54 = vpop.f32.mrf.mxu0 }
 0x2be   : > { %v1237_v55 = vadd.f32 %v1236_v54, %v1208_v14  ;;  %v1212_v59 = vpop.f32.mrf.mxu3 }
 0x2bf   : > { %v1213_v1 = vadd.f32 %v1763_v9, %v1212_v59 }
 0x2c0   : > { %v1266_v56 = vadd.f32 %v1265_v52, %v1237_v55 }
 0x2c2   : > { %1281 = vst [vmem:[%s2245_s11 + $0x18] sm:$0xff] %v1266_v56 }
 0x2c3   : > { %v1268_v63 = vpop.f32.mrf.mxu1 }
 0x2c5   : > { %v1239_v60 = vpop.f32.mrf.mxu0 }
 0x2c6   : > { %v1240_v61 = vadd.f32 %v1239_v60, %v1211_v57  ;;  %v1215_v5 = vpop.f32.mrf.mxu3 }
 0x2c7   : > { %v1216_v19 = vadd.f32 %v1763_v9, %v1215_v5 }
 0x2c8   : > { %v1269_v62 = vadd.f32 %v1268_v63, %v1240_v61 }
 0x2ca   : > { %1282 = vst [vmem:[%s2245_s11 + $0x20] sm:$0xff] %v1269_v62 }
 0x2cb   : > { %v1270_v0 = vpop.f32.mrf.mxu1 }
 0x2cd   : > { %v1241_v2 = vpop.f32.mrf.mxu0 }
 0x2ce   : > { %v1242_v3 = vadd.f32 %v1241_v2, %v1213_v1  ;;  %v1217_v12 = vpop.f32.mrf.mxu3 }
 0x2cf   : > { %v1218_v13 = vadd.f32 %v1763_v9, %v1217_v12 }
 0x2d0   : > { %v1271_v6 = vadd.f32 %v1270_v0, %v1242_v3 }
 0x2d2   : > { %1283 = vst [vmem:[%s2245_s11 + $0x28] sm:$0xff] %v1271_v6 }
 0x2d3   : > { %v1273_v8 = vpop.f32.mrf.mxu1 }
 0x2d5   : > { %v1244_v10 = vpop.f32.mrf.mxu0 }
 0x2d6   : > { %v1245_v11 = vadd.f32 %v1244_v10, %v1216_v19 }
 0x2d8   : > { %v1274_v4 = vadd.f32 %v1273_v8, %v1245_v11 }
 0x2da   : > { %1284 = vst [vmem:[%s2245_s11 + $0x30] sm:$0xff] %v1274_v4 }
 0x2db   : > { %v1275_v17 = vpop.f32.mrf.mxu1 }
 0x2dd   : > { %v1246_v15 = vpop.f32.mrf.mxu0 }
 0x2de   : > { %v1247_v16 = vadd.f32 %v1246_v15, %v1218_v13 }
 0x2e0   : > { %v1276_v18 = vadd.f32 %v1275_v17, %v1247_v16 }
 0x2e2   : > { %1285 = vst [vmem:[%s2245_s11 + $0x38] sm:$0xff] %v1276_v18 }
 0x2e3   : > { %1897 = shalt.err (!%p1894_p10)
}
 0x2e4   : > { %s1946_s14 = smov 128   ;;  %s1947_s11 = smov 8  }
 0x2e5   : > { %1699 = dma.vmem_to_hbm [thread:$0]  (%p2060_p3), %s1300_s30, 1024, %s1302_s12, %s1287_s18, %s1946_s14, %s1946_s14, %s1947_s11  }
 0x2e6 PF: > { %s1316_s20 = sand.u32 1, %s1928_s24   ;;  %p2310_p12 = scmp.ge.s32.totalorder %s1940_s27, 2 }
 0x2e7   : > { %s1317_s19 = scalar_lea.sflag [#allocation4], %s1316_s20 }
 0x2e8   : > { %p1713_p13 = pnand %p2310_p12, %p2023_p6 }
 0x2ea   : > { %p1714_p0 = pneg %p1713_p13 }
 0x2ec   : > { %1923 = dma.done.wait (%p1714_p0), %s1317_s19, 1024  }
 0x2ed   : > { %1925 = vsyncadd (%p1714_p0), %s1317_s19, 4294966272  ;;  %p21_p5 = scmp.ge.s32.totalorder %s2050_s22, 4   ;;  %s2311_s24 = smov %s1932_s25 }
 0x2ee   : > { %s2312_s25 = smov %s1936_s26  ;;  %s2313_s26 = smov %s2066_s10 }
 0x2ef   : > { %s2314_s27 = smov %s2050_s22  ;;  %23 = sbr.rel (!%p21_p5) target bundleno = 8 (0x8), region = 101 }
 0x2f4   :  { %1323 = vsyncpa [#allocation3], 1 }
 0x2f5   :  { %1325 = vsyncpa [#allocation3 + $0x1], 1 }
 0x2f6   :  { %1326 = vsyncpa [#allocation6], 1 }
 0x2f7   :  { %1327 = vsyncpa [#allocation4], 1 }
 0x2f8   :  { %1329 = vsyncpa [#allocation4 + $0x1], 1 }

</bundles_post_ra>
